<compile_context>
chip_gen: v6e
topology: v6e:2x2x1
jax: 0.10.0
libtpu: 0.0.40
codegen_flags: <defaults>
</compile_context>

<pallas_src>
import math
import functools

import numpy as np
import jax
import jax.numpy as jnp
from jax.experimental import pallas as pl
from jax.experimental.pallas import tpu as pltpu


MATMUL_DTYPE = jnp.bfloat16   # MXU-native on v5e/v6e/v7x; accumulation is f32.
LN_EPS = 1e-5                 # torch nn.LayerNorm default (module uses nn.LayerNorm).


# ----------------------------------------------------------------------------
# In-kernel math helpers
# ----------------------------------------------------------------------------

def _gelu_tanh(x):
    # tanh-approx GELU: tanh routes to the EUP slot (free vs. the 4 VALU slots).
    c = math.sqrt(2.0 / math.pi)
    return 0.5 * x * (1.0 + jnp.tanh(c * (x + 0.044715 * x * x * x)))


def _ln(x, g, b, eps):
    """LayerNorm over last dim.  x:[N,D] (f32), g/b:[1,D]."""
    mean = jnp.mean(x, axis=-1, keepdims=True)
    var = jnp.mean((x - mean) ** 2, axis=-1, keepdims=True)
    return (x - mean) * jax.lax.rsqrt(var + eps) * g + b


def _mm(a, b):
    return jnp.dot(a.astype(MATMUL_DTYPE), b.astype(MATMUL_DTYPE),
                   preferred_element_type=jnp.float32)


def _pick_tm(m, cap=512):
    """Largest row tile: full M if it fits, else largest divisor <= cap that is
    a multiple of 8 (to satisfy the (8,128) block constraint)."""
    if m <= cap:
        return m
    for t in range(cap, 7, -1):
        if m % t == 0 and t % 8 == 0:
            return t
    return m


_PARALLEL_1D = pltpu.CompilerParams(dimension_semantics=("parallel",))


# ----------------------------------------------------------------------------
# Simple fused GEMM kernels (embedding / final projection)
# ----------------------------------------------------------------------------

def _linear_kernel(x_ref, w_ref, b_ref, o_ref):
    acc = _mm(x_ref[...], w_ref[...]) + b_ref[...]
    o_ref[...] = acc.astype(o_ref.dtype)


def linear_pallas(x, w, b):
    """y = x @ w + b.  x:[M,K] w:[K,N] (bf16) b:[N]."""
    M, K = x.shape
    _, N = w.shape
    tm = _pick_tm(M)
    return pl.pallas_call(
        _linear_kernel,
        out_shape=jax.ShapeDtypeStruct((M, N), x.dtype),
        grid=(M // tm,),
        in_specs=[
            pl.BlockSpec((tm, K), lambda i: (i, 0)),
            pl.BlockSpec((K, N), lambda i: (0, 0)),
            pl.BlockSpec((1, N), lambda i: (0, 0)),
        ],
        out_specs=pl.BlockSpec((tm, N), lambda i: (i, 0)),
        compiler_params=_PARALLEL_1D,
    )(x, w, b.reshape(1, N))


def _norm_linear_kernel(x_ref, g_ref, b_ref, w_ref, bias_ref, o_ref, *, eps):
    y = _ln(x_ref[...].astype(jnp.float32), g_ref[...], b_ref[...], eps)
    o_ref[...] = (_mm(y, w_ref[...]) + bias_ref[...]).astype(o_ref.dtype)


def norm_linear_pallas(x, g, b, w, bias, eps=LN_EPS):
    """Fused LayerNorm + Linear.  x:[M,D], w:[D,N] (bf16)."""
    M, D = x.shape
    _, N = w.shape
    tm = _pick_tm(M)
    return pl.pallas_call(
        functools.partial(_norm_linear_kernel, eps=eps),
        out_shape=jax.ShapeDtypeStruct((M, N), x.dtype),
        grid=(M // tm,),
        in_specs=[
            pl.BlockSpec((tm, D), lambda i: (i, 0)),
            pl.BlockSpec((1, D), lambda i: (0, 0)),
            pl.BlockSpec((1, D), lambda i: (0, 0)),
            pl.BlockSpec((D, N), lambda i: (0, 0)),
            pl.BlockSpec((1, N), lambda i: (0, 0)),
        ],
        out_specs=pl.BlockSpec((tm, N), lambda i: (i, 0)),
        compiler_params=_PARALLEL_1D,
    )(x, g.reshape(1, D), b.reshape(1, D), w, bias.reshape(1, N))


# ----------------------------------------------------------------------------
# Fused transformer-stack kernel: grid = (batch_row, depth)
# ----------------------------------------------------------------------------

def _blocks_kernel(x_ref, n1g_ref, n1b_ref, qkvw_ref, qkvb_ref,
                   pw_ref, pb_ref, n2g_ref, n2b_ref,
                   f1w_ref, f1b_ref, f2w_ref, f2b_ref, o_ref,
                   *, num_heads, eps):
    """One pre-LN transformer block for one batch row [N, D].

    The token row lives in o_ref across the depth grid axis (output block index
    is constant along depth), so intermediate activations never leave VMEM.
    """
    d = pl.program_id(1)

    @pl.when(d == 0)
    def _():
        o_ref[...] = x_ref[...]

    x = o_ref[0].astype(jnp.float32)                   # [N, D]
    N, D = x.shape
    H = num_heads
    Dh = D // H

    # ---- attention branch: LN1 -> fused QKV -> batched-head attention -> proj
    h = _ln(x, n1g_ref[0], n1b_ref[0], eps)
    qkv = _mm(h, qkvw_ref[0]) + qkvb_ref[0]            # [N, 3D]; scale baked into W_q
    qh = jnp.swapaxes(qkv[:, 0 * D:1 * D].reshape(N, H, Dh), 0, 1)   # [H, N, Dh]
    kh = jnp.swapaxes(qkv[:, 1 * D:2 * D].reshape(N, H, Dh), 0, 1)
    vh = jnp.swapaxes(qkv[:, 2 * D:3 * D].reshape(N, H, Dh), 0, 1)

    # Batched QK^T (no k.T materialization; heads = batch dim of dot_general).
    s = jnp.einsum('hqd,hkd->hqk', qh.astype(MATMUL_DTYPE), kh.astype(MATMUL_DTYPE),
                   preferred_element_type=jnp.float32)               # [H, N, N]
    s = s - jnp.max(s, axis=-1, keepdims=True)
    p = jnp.exp(s)
    p = p * pl.reciprocal(jnp.sum(p, axis=-1, keepdims=True), approx=True)
    o_h = jnp.einsum('hqk,hkd->hqd', p.astype(MATMUL_DTYPE), vh,
                     preferred_element_type=jnp.float32)             # [H, N, Dh]

    o_cat = jnp.swapaxes(o_h, 0, 1).reshape(N, D)                    # [N, D]
    x = x + _mm(o_cat, pw_ref[0]) + pb_ref[0]          # single [N,D]x[D,D] proj + bias

    # ---- MLP branch: LN2 -> fc1 -> GELU(tanh) -> fc2 -> residual
    m = _ln(x, n2g_ref[0], n2b_ref[0], eps)
    m = _gelu_tanh(_mm(m, f1w_ref[0]) + f1b_ref[0])
    m = _mm(m, f2w_ref[0]) + f2b_ref[0]
    o_ref[0] = (x + m).astype(o_ref.dtype)


def blocks_forward_pallas(bp, x, num_heads, eps=LN_EPS):
    """Run the whole stacked transformer: x [Bt, Nt, D] -> [Bt, Nt, D].

    One pallas_call; grid=(Bt, depth).  Depth is innermost & 'arbitrary' so the
    token row (output block) stays resident in VMEM across all layers while
    next-layer weights are streamed (double-buffered) behind compute.
    """
    Bt, Nt, D = x.shape
    L = bp["qkv_w"].shape[0]
    Hm = bp["fc1_w"].shape[2]

    row = lambda b, d: (b, 0, 0)
    lyr = lambda b, d: (d, 0, 0)

    # TODO(synk): at production sizes (pred_dim>=384) set an explicit
    # vmem_limit_bytes for v7x (64 MiB physical VMEM) and consider a second
    # parallel grid axis over token tiles; irrelevant at these toy shapes.
    return pl.pallas_call(
        functools.partial(_blocks_kernel, num_heads=num_heads, eps=eps),
        out_shape=jax.ShapeDtypeStruct((Bt, Nt, D), x.dtype),
        grid=(Bt, L),
        in_specs=[
            pl.BlockSpec((1, Nt, D), row),          # x (read only at depth 0)
            pl.BlockSpec((1, 1, D), lyr),           # norm1 gamma
            pl.BlockSpec((1, 1, D), lyr),           # norm1 beta
            pl.BlockSpec((1, D, 3 * D), lyr),       # qkv weight (bf16, scale baked)
            pl.BlockSpec((1, 1, 3 * D), lyr),       # qkv bias
            pl.BlockSpec((1, D, D), lyr),           # attn proj weight (bf16)
            pl.BlockSpec((1, 1, D), lyr),           # attn proj bias
            pl.BlockSpec((1, 1, D), lyr),           # norm2 gamma
            pl.BlockSpec((1, 1, D), lyr),           # norm2 beta
            pl.BlockSpec((1, D, Hm), lyr),          # fc1 weight (bf16)
            pl.BlockSpec((1, 1, Hm), lyr),          # fc1 bias
            pl.BlockSpec((1, Hm, D), lyr),          # fc2 weight (bf16)
            pl.BlockSpec((1, 1, D), lyr),           # fc2 bias
        ],
        out_specs=pl.BlockSpec((1, Nt, D), row),
        compiler_params=pltpu.CompilerParams(
            dimension_semantics=("parallel", "arbitrary")),
    )(x, bp["n1g"], bp["n1b"], bp["qkv_w"], bp["qkv_b"],
      bp["proj_w"], bp["proj_b"], bp["n2g"], bp["n2b"],
      bp["fc1_w"], bp["fc1_b"], bp["fc2_w"], bp["fc2_b"])


# ----------------------------------------------------------------------------
# Sin-cos positional embedding (matches get_2d_sincos_pos_embed)
# ----------------------------------------------------------------------------

def _get_1d_sincos(embed_dim, pos):
    omega = np.arange(embed_dim // 2, dtype=np.float64) / (embed_dim / 2.0)
    omega = 1.0 / (10000 ** omega)
    out = np.einsum("m,d->md", pos.reshape(-1), omega)
    return np.concatenate([np.sin(out), np.cos(out)], axis=1)


def get_2d_sincos_pos_embed(embed_dim, grid_size):
    grid_h = np.arange(grid_size, dtype=np.float64)
    grid_w = np.arange(grid_size, dtype=np.float64)
    grid = np.meshgrid(grid_w, grid_h)  # w first
    grid = np.stack(grid, axis=0).reshape([2, 1, grid_size, grid_size])
    emb_h = _get_1d_sincos(embed_dim // 2, grid[0])
    emb_w = _get_1d_sincos(embed_dim // 2, grid[1])
    return np.concatenate([emb_h, emb_w], axis=1).astype(np.float32)


# ----------------------------------------------------------------------------
# Masking helpers (mirror apply_masks / repeat_interleave_batch)
# TODO(synk): data-dependent token gather stays in XLA glue (no clean tile map).
# ----------------------------------------------------------------------------

def apply_masks(x, masks):
    out = []
    for m in masks:
        out.append(jnp.take_along_axis(x, m[:, :, None], axis=1))
    return jnp.concatenate(out, axis=0)


def repeat_interleave_batch(x, B, repeat):
    N = x.shape[0] // B
    chunks = [jnp.concatenate([x[i * B:(i + 1) * B]] * repeat, axis=0)
              for i in range(N)]
    return jnp.concatenate(chunks, axis=0)


# ----------------------------------------------------------------------------
# Parameter initialization + packing (deterministic, synthetic)
# ----------------------------------------------------------------------------

def init_params(key, *, embed_dim, pred_dim, depth, num_heads, mlp_ratio,
                num_patches, num_mask_tokens, init_std=0.02):
    hidden = int(pred_dim * mlp_ratio)
    keys = iter(jax.random.split(key, 8 + depth * 8))
    nk = lambda: next(keys)
    norm = lambda k, shape: (init_std * jax.random.normal(k, shape, jnp.float32))

    params = {
        "embed_w": norm(nk(), (embed_dim, pred_dim)),
        "embed_b": jnp.zeros((pred_dim,), jnp.float32),
        "proj_w": norm(nk(), (pred_dim, embed_dim)),
        "proj_b": jnp.zeros((embed_dim,), jnp.float32),
        "norm_g": jnp.ones((pred_dim,), jnp.float32),
        "norm_b": jnp.zeros((pred_dim,), jnp.float32),
        "pos_embed": jnp.asarray(
            get_2d_sincos_pos_embed(pred_dim, int(math.sqrt(num_patches)))
        )[None, :, :],
        # zero_init_mask_tokens=True
        "mask_tokens": [jnp.zeros((1, 1, pred_dim), jnp.float32)
                        for _ in range(num_mask_tokens)],
        "blocks": [],
    }
    for layer_id in range(depth):
        rescale = 1.0 / math.sqrt(2.0 * (layer_id + 1))
        blk = {
            "norm1_g": jnp.ones((pred_dim,), jnp.float32),
            "norm1_b": jnp.zeros((pred_dim,), jnp.float32),
            "qkv_w": norm(nk(), (pred_dim, 3 * pred_dim)),
            "qkv_b": jnp.zeros((3 * pred_dim,), jnp.float32),
            "attn_proj_w": norm(nk(), (pred_dim, pred_dim)) * rescale,
            "attn_proj_b": jnp.zeros((pred_dim,), jnp.float32),
            "norm2_g": jnp.ones((pred_dim,), jnp.float32),
            "norm2_b": jnp.zeros((pred_dim,), jnp.float32),
            "fc1_w": norm(nk(), (pred_dim, hidden)),
            "fc1_b": jnp.zeros((hidden,), jnp.float32),
            "fc2_w": norm(nk(), (hidden, pred_dim)) * rescale,
            "fc2_b": jnp.zeros((pred_dim,), jnp.float32),
        }
        params["blocks"].append(blk)
    return params


def pack_params(params, num_heads):
    """Stack per-layer block weights along a leading depth axis, cast GEMM
    weights to bf16, and bake the attention scale into the Q columns of qkv."""
    blocks = params["blocks"]
    D = blocks[0]["qkv_w"].shape[0]
    Dh = D // num_heads
    scale = Dh ** -0.5

    def stk(fn):
        return jnp.stack([fn(b) for b in blocks], axis=0)

    def scaled_qkv_w(b):
        w = b["qkv_w"]
        return jnp.concatenate([w[:, :D] * scale, w[:, D:]], axis=1)

    def scaled_qkv_b(b):
        bb = b["qkv_b"]
        return jnp.concatenate([bb[:D] * scale, bb[D:]], axis=0)

    blk = {
        "n1g": stk(lambda b: b["norm1_g"].reshape(1, D)),
        "n1b": stk(lambda b: b["norm1_b"].reshape(1, D)),
        "qkv_w": stk(scaled_qkv_w).astype(MATMUL_DTYPE),
        "qkv_b": stk(lambda b: scaled_qkv_b(b).reshape(1, 3 * D)),
        "proj_w": stk(lambda b: b["attn_proj_w"]).astype(MATMUL_DTYPE),
        "proj_b": stk(lambda b: b["attn_proj_b"].reshape(1, D)),
        "n2g": stk(lambda b: b["norm2_g"].reshape(1, D)),
        "n2b": stk(lambda b: b["norm2_b"].reshape(1, D)),
        "fc1_w": stk(lambda b: b["fc1_w"]).astype(MATMUL_DTYPE),
        "fc1_b": stk(lambda b: b["fc1_b"].reshape(1, -1)),
        "fc2_w": stk(lambda b: b["fc2_w"]).astype(MATMUL_DTYPE),
        "fc2_b": stk(lambda b: b["fc2_b"].reshape(1, D)),
    }
    return {
        "embed_w": params["embed_w"].astype(MATMUL_DTYPE),
        "embed_b": params["embed_b"],
        "proj_w": params["proj_w"].astype(MATMUL_DTYPE),
        "proj_b": params["proj_b"],
        "norm_g": params["norm_g"],
        "norm_b": params["norm_b"],
        "pos_embed": params["pos_embed"],
        "mask_tokens": list(params["mask_tokens"]),
        "blk": blk,
    }


# ----------------------------------------------------------------------------
# Full predictor forward
# ----------------------------------------------------------------------------

def predictor_forward(params, x, masks_x, masks_y, *, num_heads, num_patches,
                      num_mask_tokens, mask_index=1):
    if not isinstance(masks_x, (list, tuple)):
        masks_x = [masks_x]
    if not isinstance(masks_y, (list, tuple)):
        masks_y = [masks_y]

    B = x.shape[0] // len(masks_x)
    Bx, N_ctxt, E = x.shape
    D = params["embed_w"].shape[1]

    # -- predictor_embed (single Pallas GEMM over all context rows) -----------
    h = linear_pallas(x.reshape(Bx * N_ctxt, E), params["embed_w"], params["embed_b"])
    h = h.reshape(Bx, N_ctxt, D)

    # -- add gathered positional embeddings (use_rope=False path) -------------
    pos = jnp.broadcast_to(params["pos_embed"], (B, num_patches, D))
    h = h + apply_masks(pos, masks_x)

    # -- mask (prediction) tokens ---------------------------------------------
    mask_index = mask_index % num_mask_tokens
    pred = jnp.broadcast_to(params["mask_tokens"][mask_index], (B, num_patches, D))
    pred = apply_masks(pred, masks_y)
    pos_y = apply_masks(pos, masks_y)
    pos_y = repeat_interleave_batch(pos_y, B, repeat=len(masks_x))
    pred = pred + pos_y

    # -- concat context + pred tokens.
    #    NOTE: the reference sorts tokens by patch index before the blocks and
    #    un-sorts after; with use_rope=False, no attention mask and per-token
    #    LayerNorm the stack is permutation-equivariant and positional
    #    embeddings are already added, so sort+unsort cancel and are dropped.
    h = jnp.tile(h, (len(masks_x), 1, 1))
    h = jnp.concatenate([h, pred], axis=1)

    # -- whole transformer stack: ONE fused Pallas kernel (grid = batch x depth)
    h = blocks_forward_pallas(params["blk"], h, num_heads)

    # -- keep predicted (target) tokens (return_all_tokens=False) and apply the
    #    fused final LayerNorm + predictor_proj to them only.
    h = h[:, N_ctxt:]
    Bt2, Nt2, _ = h.shape
    out = norm_linear_pallas(h.reshape(Bt2 * Nt2, D),
                             params["norm_g"], params["norm_b"],
                             params["proj_w"], params["proj_b"])
    return out.reshape(Bt2, Nt2, E)


# ----------------------------------------------------------------------------
# Main
# ----------------------------------------------------------------------------

if __name__ == "__main__":
    # Small config consistent with the module: img 64x64, patch 16 -> 4x4 = 16
    # patches; embed_dim=64, predictor_embed_dim=32, depth=2, heads=4, mlp x4.
    embed_dim = 64
    pred_dim = 32
    depth = 2
    num_heads = 4
    mlp_ratio = 4.0
    num_patches = 16            # (64 // 16) ** 2
    num_mask_tokens = 2         # use_mask_tokens=True, zero_init_mask_tokens=True
    B = 2
    N_ctxt = 8
    N_tgt = 8

    key = jax.random.PRNGKey(0)
    k_par, k_x, k_perm = jax.random.split(key, 3)

    raw_params = init_params(
        k_par, embed_dim=embed_dim, pred_dim=pred_dim, depth=depth,
        num_heads=num_heads, mlp_ratio=mlp_ratio, num_patches=num_patches,
        num_mask_tokens=num_mask_tokens)
    params = pack_params(raw_params, num_heads)

    # disjoint context / target index sets per batch element
    perms = jnp.stack([jax.random.permutation(k, num_patches)
                       for k in jax.random.split(k_perm, B)]).astype(jnp.int32)
    masks_x = [perms[:, :N_ctxt]]          # list of (B, N_ctxt) index arrays
    masks_y = [perms[:, N_ctxt:]]          # list of (B, N_tgt) index arrays

    x = jax.random.normal(k_x, (B * len(masks_x), N_ctxt, embed_dim), jnp.float32)

    fwd = jax.jit(functools.partial(
        predictor_forward, num_heads=num_heads, num_patches=num_patches,
        num_mask_tokens=num_mask_tokens, mask_index=1))
    out = fwd(params, x, masks_x, masks_y)
    out = jax.block_until_ready(out)

    assert out.shape == (B, N_tgt, embed_dim), out.shape
    assert bool(jnp.all(jnp.isfinite(out)))
    print("KERNEL_OK")
</pallas_src>

<mosaic_0001>
module attributes {stable_mosaic.version = 11 : i64} {
  func.func @_linear_kernel(%arg0: i32, %arg1: memref<16x64xf32, #tpu.memory_space<vmem>>, %arg2: memref<64x32xbf16, #tpu.memory_space<vmem>>, %arg3: memref<1x32xf32, #tpu.memory_space<vmem>>, %arg4: memref<16x32xf32, #tpu.memory_space<vmem>>) attributes {dimension_semantics = [#tpu.dimension_semantics<parallel>], iteration_bounds = array<i64: 1>, scalar_prefetch = 0 : i64, scratch_operands = 0 : i64, tpu.core_type = #tpu.core_type<tc>, window_params = [{transform_indices = @transform_0, window_bounds = array<i64: 16, 64>}, {pipeline_mode = #tpu.pipeline_mode<synchronous>, transform_indices = @transform_1, window_bounds = array<i64: 64, 32>}, {pipeline_mode = #tpu.pipeline_mode<synchronous>, transform_indices = @transform_2, window_bounds = array<i64: 1, 32>}, {transform_indices = @transform_3, window_bounds = array<i64: 16, 32>}]} {
    %c0 = arith.constant 0 : index
    %c0_0 = arith.constant 0 : index
    %0 = vector.load %arg1[%c0, %c0_0] : memref<16x64xf32, #tpu.memory_space<vmem>>, vector<16x64xf32>
    %c0_1 = arith.constant 0 : index
    %c0_2 = arith.constant 0 : index
    %1 = vector.load %arg2[%c0_1, %c0_2] : memref<64x32xbf16, #tpu.memory_space<vmem>>, vector<64x32xbf16>
    %2 = arith.truncf %0 : vector<16x64xf32> to vector<16x64xbf16>
    %cst = arith.constant dense<0.000000e+00> : vector<16x32xf32>
    %3 = tpu.matmul %2, %1, %cst {dimension_numbers = #tpu.dot_dimension_numbers<[1], [0], [0], [1], [0, 0, 1, 1], [], []>} : vector<16x64xbf16>, vector<64x32xbf16>, vector<16x32xf32> -> vector<16x32xf32>
    %c0_3 = arith.constant 0 : index
    %c0_4 = arith.constant 0 : index
    %4 = vector.load %arg3[%c0_3, %c0_4] : memref<1x32xf32, #tpu.memory_space<vmem>>, vector<1x32xf32>
    %5 = vector.broadcast %4 : vector<1x32xf32> to vector<16x32xf32>
    %6 = arith.addf %3, %5 : vector<16x32xf32>
    %c0_5 = arith.constant 0 : index
    %c0_6 = arith.constant 0 : index
    %7 = vector.load %arg4[%c0_5, %c0_6] : memref<16x32xf32, #tpu.memory_space<vmem>>, vector<16x32xf32>
    tpu.vector_store %arg4[%c0_5, %c0_6], %6 {strides = array<i32>} : memref<16x32xf32, #tpu.memory_space<vmem>>, vector<16x32xf32>,
    return
  }
  func.func @transform_0(%arg0: i32) -> (i32, i32) {
    %c0_i32 = arith.constant 0 : i32
    %c0_i32_0 = arith.constant 0 : i32
    return %arg0, %c0_i32 : i32, i32
  }
  func.func @transform_1(%arg0: i32) -> (i32, i32) {
    %c0_i32 = arith.constant 0 : i32
    %c0_i32_0 = arith.constant 0 : i32
    %c0_i32_1 = arith.constant 0 : i32
    return %c0_i32, %c0_i32_0 : i32, i32
  }
  func.func @transform_2(%arg0: i32) -> (i32, i32) {
    %c0_i32 = arith.constant 0 : i32
    %c0_i32_0 = arith.constant 0 : i32
    %c0_i32_1 = arith.constant 0 : i32
    return %c0_i32, %c0_i32_0 : i32, i32
  }
  func.func @transform_3(%arg0: i32) -> (i32, i32) {
    %c0_i32 = arith.constant 0 : i32
    %c0_i32_0 = arith.constant 0 : i32
    return %arg0, %c0_i32 : i32, i32
  }
}

module attributes {stable_mosaic.version = 11 : i64} {
  func.func @_blocks_kernel(%arg0: i32, %arg1: i32, %arg2: memref<1x16x32xf32, #tpu.memory_space<vmem>>, %arg3: memref<1x1x32xf32, #tpu.memory_space<vmem>>, %arg4: memref<1x1x32xf32, #tpu.memory_space<vmem>>, %arg5: memref<1x32x96xbf16, #tpu.memory_space<vmem>>, %arg6: memref<1x1x96xf32, #tpu.memory_space<vmem>>, %arg7: memref<1x32x32xbf16, #tpu.memory_space<vmem>>, %arg8: memref<1x1x32xf32, #tpu.memory_space<vmem>>, %arg9: memref<1x1x32xf32, #tpu.memory_space<vmem>>, %arg10: memref<1x1x32xf32, #tpu.memory_space<vmem>>, %arg11: memref<1x32x128xbf16, #tpu.memory_space<vmem>>, %arg12: memref<1x1x128xf32, #tpu.memory_space<vmem>>, %arg13: memref<1x128x32xbf16, #tpu.memory_space<vmem>>, %arg14: memref<1x1x32xf32, #tpu.memory_space<vmem>>, %arg15: memref<1x16x32xf32, #tpu.memory_space<vmem>>) attributes {dimension_semantics = [#tpu.dimension_semantics<parallel>, #tpu.dimension_semantics<arbitrary>], iteration_bounds = array<i64: 2, 2>, scalar_prefetch = 0 : i64, scratch_operands = 0 : i64, tpu.core_type = #tpu.core_type<tc>, window_params = [{transform_indices = @transform_0, window_bounds = array<i64: 1, 16, 32>}, {transform_indices = @transform_1, window_bounds = array<i64: 1, 1, 32>}, {transform_indices = @transform_2, window_bounds = array<i64: 1, 1, 32>}, {transform_indices = @transform_3, window_bounds = array<i64: 1, 32, 96>}, {transform_indices = @transform_4, window_bounds = array<i64: 1, 1, 96>}, {transform_indices = @transform_5, window_bounds = array<i64: 1, 32, 32>}, {transform_indices = @transform_6, window_bounds = array<i64: 1, 1, 32>}, {transform_indices = @transform_7, window_bounds = array<i64: 1, 1, 32>}, {transform_indices = @transform_8, window_bounds = array<i64: 1, 1, 32>}, {transform_indices = @transform_9, window_bounds = array<i64: 1, 32, 128>}, {transform_indices = @transform_10, window_bounds = array<i64: 1, 1, 128>}, {transform_indices = @transform_11, window_bounds = array<i64: 1, 128, 32>}, {transform_indices = @transform_12, window_bounds = array<i64: 1, 1, 32>}, {transform_indices = @transform_13, window_bounds = array<i64: 1, 16, 32>}]} {
    %c0_i32 = arith.constant 0 : i32
    %0 = arith.cmpi eq, %arg1, %c0_i32 : i32
    %1 = arith.extui %0 : i1 to i32
    %c0_i32_0 = arith.constant 0 : i32
    %2 = arith.cmpi ne, %1, %c0_i32_0 : i32
    scf.if %2 {
      %c0_63 = arith.constant 0 : index
      %c0_64 = arith.constant 0 : index
      %c0_65 = arith.constant 0 : index
      %133 = vector.load %arg2[%c0_63, %c0_64, %c0_65] : memref<1x16x32xf32, #tpu.memory_space<vmem>>, vector<1x16x32xf32>
      %c0_66 = arith.constant 0 : index
      %c0_67 = arith.constant 0 : index
      %c0_68 = arith.constant 0 : index
      %134 = vector.load %arg15[%c0_66, %c0_67, %c0_68] : memref<1x16x32xf32, #tpu.memory_space<vmem>>, vector<1x16x32xf32>
      tpu.vector_store %arg15[%c0_66, %c0_67, %c0_68], %133 {strides = array<i32>} : memref<1x16x32xf32, #tpu.memory_space<vmem>>, vector<1x16x32xf32>,
    } else {
    }
    %c0 = arith.constant 0 : index
    %c0_1 = arith.constant 0 : index
    %c0_2 = arith.constant 0 : index
    %3 = vector.load %arg15[%c0, %c0_1, %c0_2] : memref<1x16x32xf32, #tpu.memory_space<vmem>>, vector<1x16x32xf32>
    %4 = vector.shape_cast %3 : vector<1x16x32xf32> to vector<16x32xf32>
    %c0_3 = arith.constant 0 : index
    %c0_4 = arith.constant 0 : index
    %c0_5 = arith.constant 0 : index
    %5 = vector.load %arg3[%c0_3, %c0_4, %c0_5] : memref<1x1x32xf32, #tpu.memory_space<vmem>>, vector<1x1x32xf32>
    %6 = vector.shape_cast %5 : vector<1x1x32xf32> to vector<1x32xf32>
    %c0_6 = arith.constant 0 : index
    %c0_7 = arith.constant 0 : index
    %c0_8 = arith.constant 0 : index
    %7 = vector.load %arg4[%c0_6, %c0_7, %c0_8] : memref<1x1x32xf32, #tpu.memory_space<vmem>>, vector<1x1x32xf32>
    %8 = vector.shape_cast %7 : vector<1x1x32xf32> to vector<1x32xf32>
    %cst = arith.constant dense<0.000000e+00> : vector<16xf32>
    %9 = vector.multi_reduction <add>, %4, %cst [1] : vector<16x32xf32> to vector<16xf32>
    %10 = vector.shape_cast %9 : vector<16xf32> to vector<16x1xf32>
    %cst_9 = arith.constant 3.200000e+01 : f32
    %11 = vector.broadcast %cst_9 : f32 to vector<16x1xf32>
    %12 = arith.divf %10, %11 : vector<16x1xf32>
    %13 = vector.broadcast %12 : vector<16x1xf32> to vector<16x32xf32>
    %14 = arith.subf %4, %13 : vector<16x32xf32>
    %15 = arith.mulf %14, %14 : vector<16x32xf32>
    %cst_10 = arith.constant dense<0.000000e+00> : vector<16xf32>
    %16 = vector.multi_reduction <add>, %15, %cst_10 [1] : vector<16x32xf32> to vector<16xf32>
    %17 = vector.shape_cast %16 : vector<16xf32> to vector<16x1xf32>
    %cst_11 = arith.constant 3.200000e+01 : f32
    %18 = vector.broadcast %cst_11 : f32 to vector<16x1xf32>
    %19 = arith.divf %17, %18 : vector<16x1xf32>
    %20 = vector.broadcast %12 : vector<16x1xf32> to vector<16x32xf32>
    %21 = arith.subf %4, %20 : vector<16x32xf32>
    %cst_12 = arith.constant 9.99999974E-6 : f32
    %22 = vector.broadcast %cst_12 : f32 to vector<16x1xf32>
    %23 = arith.addf %19, %22 : vector<16x1xf32>
    %24 = math.rsqrt %23 : vector<16x1xf32>
    %25 = vector.broadcast %24 : vector<16x1xf32> to vector<16x32xf32>
    %26 = arith.mulf %21, %25 : vector<16x32xf32>
    %27 = vector.broadcast %6 : vector<1x32xf32> to vector<16x32xf32>
    %28 = arith.mulf %26, %27 : vector<16x32xf32>
    %29 = vector.broadcast %8 : vector<1x32xf32> to vector<16x32xf32>
    %30 = arith.addf %28, %29 : vector<16x32xf32>
    %c0_13 = arith.constant 0 : index
    %c0_14 = arith.constant 0 : index
    %c0_15 = arith.constant 0 : index
    %31 = vector.load %arg5[%c0_13, %c0_14, %c0_15] : memref<1x32x96xbf16, #tpu.memory_space<vmem>>, vector<1x32x96xbf16>
    %32 = vector.shape_cast %31 : vector<1x32x96xbf16> to vector<32x96xbf16>
    %33 = arith.truncf %30 : vector<16x32xf32> to vector<16x32xbf16>
    %cst_16 = arith.constant dense<0.000000e+00> : vector<16x96xf32>
    %34 = tpu.matmul %33, %32, %cst_16 {dimension_numbers = #tpu.dot_dimension_numbers<[1], [0], [0], [1], [0, 0, 1, 1], [], []>} : vector<16x32xbf16>, vector<32x96xbf16>, vector<16x96xf32> -> vector<16x96xf32>
    %c0_17 = arith.constant 0 : index
    %c0_18 = arith.constant 0 : index
    %c0_19 = arith.constant 0 : index
    %35 = vector.load %arg6[%c0_17, %c0_18, %c0_19] : memref<1x1x96xf32, #tpu.memory_space<vmem>>, vector<1x1x96xf32>
    %36 = vector.shape_cast %35 : vector<1x1x96xf32> to vector<1x96xf32>
    %37 = vector.broadcast %36 : vector<1x96xf32> to vector<16x96xf32>
    %38 = arith.addf %34, %37 : vector<16x96xf32>
    %39 = vector.extract_strided_slice %38 {offsets = [0, 0], sizes = [16, 32], strides = [1, 1]} : vector<16x96xf32> to vector<16x32xf32>
    %40 = vector.shape_cast %39 : vector<16x32xf32> to vector<16x4x8xf32>
    %41 = tpu.transpose %40, [1, 0, 2] : vector<16x4x8xf32> -> vector<4x16x8xf32>
    %42 = vector.extract_strided_slice %38 {offsets = [0, 32], sizes = [16, 32], strides = [1, 1]} : vector<16x96xf32> to vector<16x32xf32>
    %43 = vector.shape_cast %42 : vector<16x32xf32> to vector<16x4x8xf32>
    %44 = tpu.transpose %43, [1, 0, 2] : vector<16x4x8xf32> -> vector<4x16x8xf32>
    %45 = vector.extract_strided_slice %38 {offsets = [0, 64], sizes = [16, 32], strides = [1, 1]} : vector<16x96xf32> to vector<16x32xf32>
    %46 = vector.shape_cast %45 : vector<16x32xf32> to vector<16x4x8xf32>
    %47 = tpu.transpose %46, [1, 0, 2] : vector<16x4x8xf32> -> vector<4x16x8xf32>
    %48 = arith.truncf %41 : vector<4x16x8xf32> to vector<4x16x8xbf16>
    %49 = arith.truncf %44 : vector<4x16x8xf32> to vector<4x16x8xbf16>
    "tpu.trace_start"() <{level = 10 : i32, message = "hqd,hkd->hqk"}> : () -> ()
    %cst_20 = arith.constant dense<0.000000e+00> : vector<4x16x16xf32>
    %50 = tpu.matmul %48, %49, %cst_20 {dimension_numbers = #tpu.dot_dimension_numbers<[2], [2], [1], [1], [0, 0, 0, 1, 1, 1], [0], [0]>} : vector<4x16x8xbf16>, vector<4x16x8xbf16>, vector<4x16x16xf32> -> vector<4x16x16xf32>
    "tpu.trace_stop"() : () -> ()
    %cst_21 = arith.constant dense<0xFF800000> : vector<4x16xf32>
    %51 = vector.multi_reduction <maximumf>, %50, %cst_21 [2] : vector<4x16x16xf32> to vector<4x16xf32>
    %52 = vector.shape_cast %51 : vector<4x16xf32> to vector<4x16x1xf32>
    %53 = vector.broadcast %52 : vector<4x16x1xf32> to vector<4x16x16xf32>
    %54 = arith.subf %50, %53 : vector<4x16x16xf32>
    %55 = math.exp %54 : vector<4x16x16xf32>
    %cst_22 = arith.constant dense<0.000000e+00> : vector<4x16xf32>
    %56 = vector.multi_reduction <add>, %55, %cst_22 [2] : vector<4x16x16xf32> to vector<4x16xf32>
    %57 = vector.shape_cast %56 : vector<4x16xf32> to vector<4x16x1xf32>
    %58 = tpu.reciprocal %57 {approx = true} : vector<4x16x1xf32> -> vector<4x16x1xf32>
    %59 = vector.broadcast %58 : vector<4x16x1xf32> to vector<4x16x16xf32>
    %60 = arith.mulf %55, %59 : vector<4x16x16xf32>
    %61 = arith.truncf %60 : vector<4x16x16xf32> to vector<4x16x16xbf16>
    "tpu.trace_start"() <{level = 10 : i32, message = "hqk,hkd->hqd"}> : () -> ()
    %cst_23 = arith.constant dense<0.000000e+00> : vector<4x16x8xf32>
    %62 = tpu.matmul %61, %47, %cst_23 {dimension_numbers = #tpu.dot_dimension_numbers<[2], [1], [1], [2], [0, 0, 0, 1, 1, 2], [0], [0]>} : vector<4x16x16xbf16>, vector<4x16x8xf32>, vector<4x16x8xf32> -> vector<4x16x8xf32>
    "tpu.trace_stop"() : () -> ()
    %63 = tpu.transpose %62, [1, 0, 2] : vector<4x16x8xf32> -> vector<16x4x8xf32>
    %64 = vector.shape_cast %63 : vector<16x4x8xf32> to vector<16x32xf32>
    %c0_24 = arith.constant 0 : index
    %c0_25 = arith.constant 0 : index
    %c0_26 = arith.constant 0 : index
    %65 = vector.load %arg7[%c0_24, %c0_25, %c0_26] : memref<1x32x32xbf16, #tpu.memory_space<vmem>>, vector<1x32x32xbf16>
    %66 = vector.shape_cast %65 : vector<1x32x32xbf16> to vector<32x32xbf16>
    %67 = arith.truncf %64 : vector<16x32xf32> to vector<16x32xbf16>
    %cst_27 = arith.constant dense<0.000000e+00> : vector<16x32xf32>
    %68 = tpu.matmul %67, %66, %cst_27 {dimension_numbers = #tpu.dot_dimension_numbers<[1], [0], [0], [1], [0, 0, 1, 1], [], []>} : vector<16x32xbf16>, vector<32x32xbf16>, vector<16x32xf32> -> vector<16x32xf32>
    %69 = arith.addf %4, %68 : vector<16x32xf32>
    %c0_28 = arith.constant 0 : index
    %c0_29 = arith.constant 0 : index
    %c0_30 = arith.constant 0 : index
    %70 = vector.load %arg8[%c0_28, %c0_29, %c0_30] : memref<1x1x32xf32, #tpu.memory_space<vmem>>, vector<1x1x32xf32>
    %71 = vector.shape_cast %70 : vector<1x1x32xf32> to vector<1x32xf32>
    %72 = vector.broadcast %71 : vector<1x32xf32> to vector<16x32xf32>
    %73 = arith.addf %69, %72 : vector<16x32xf32>
    %c0_31 = arith.constant 0 : index
    %c0_32 = arith.constant 0 : index
    %c0_33 = arith.constant 0 : index
    %74 = vector.load %arg9[%c0_31, %c0_32, %c0_33] : memref<1x1x32xf32, #tpu.memory_space<vmem>>, vector<1x1x32xf32>
    %75 = vector.shape_cast %74 : vector<1x1x32xf32> to vector<1x32xf32>
    %c0_34 = arith.constant 0 : index
    %c0_35 = arith.constant 0 : index
    %c0_36 = arith.constant 0 : index
    %76 = vector.load %arg10[%c0_34, %c0_35, %c0_36] : memref<1x1x32xf32, #tpu.memory_space<vmem>>, vector<1x1x32xf32>
    %77 = vector.shape_cast %76 : vector<1x1x32xf32> to vector<1x32xf32>
    %cst_37 = arith.constant dense<0.000000e+00> : vector<16xf32>
    %78 = vector.multi_reduction <add>, %73, %cst_37 [1] : vector<16x32xf32> to vector<16xf32>
    %79 = vector.shape_cast %78 : vector<16xf32> to vector<16x1xf32>
    %cst_38 = arith.constant 3.200000e+01 : f32
    %80 = vector.broadcast %cst_38 : f32 to vector<16x1xf32>
    %81 = arith.divf %79, %80 : vector<16x1xf32>
    %82 = vector.broadcast %81 : vector<16x1xf32> to vector<16x32xf32>
    %83 = arith.subf %73, %82 : vector<16x32xf32>
    %84 = arith.mulf %83, %83 : vector<16x32xf32>
    %cst_39 = arith.constant dense<0.000000e+00> : vector<16xf32>
    %85 = vector.multi_reduction <add>, %84, %cst_39 [1] : vector<16x32xf32> to vector<16xf32>
    %86 = vector.shape_cast %85 : vector<16xf32> to vector<16x1xf32>
    %cst_40 = arith.constant 3.200000e+01 : f32
    %87 = vector.broadcast %cst_40 : f32 to vector<16x1xf32>
    %88 = arith.divf %86, %87 : vector<16x1xf32>
    %89 = vector.broadcast %81 : vector<16x1xf32> to vector<16x32xf32>
    %90 = arith.subf %73, %89 : vector<16x32xf32>
    %cst_41 = arith.constant 9.99999974E-6 : f32
    %91 = vector.broadcast %cst_41 : f32 to vector<16x1xf32>
    %92 = arith.addf %88, %91 : vector<16x1xf32>
    %93 = math.rsqrt %92 : vector<16x1xf32>
    %94 = vector.broadcast %93 : vector<16x1xf32> to vector<16x32xf32>
    %95 = arith.mulf %90, %94 : vector<16x32xf32>
    %96 = vector.broadcast %75 : vector<1x32xf32> to vector<16x32xf32>
    %97 = arith.mulf %95, %96 : vector<16x32xf32>
    %98 = vector.broadcast %77 : vector<1x32xf32> to vector<16x32xf32>
    %99 = arith.addf %97, %98 : vector<16x32xf32>
    %c0_42 = arith.constant 0 : index
    %c0_43 = arith.constant 0 : index
    %c0_44 = arith.constant 0 : index
    %100 = vector.load %arg11[%c0_42, %c0_43, %c0_44] : memref<1x32x128xbf16, #tpu.memory_space<vmem>>, vector<1x32x128xbf16>
    %101 = vector.shape_cast %100 : vector<1x32x128xbf16> to vector<32x128xbf16>
    %102 = arith.truncf %99 : vector<16x32xf32> to vector<16x32xbf16>
    %cst_45 = arith.constant dense<0.000000e+00> : vector<16x128xf32>
    %103 = tpu.matmul %102, %101, %cst_45 {dimension_numbers = #tpu.dot_dimension_numbers<[1], [0], [0], [1], [0, 0, 1, 1], [], []>} : vector<16x32xbf16>, vector<32x128xbf16>, vector<16x128xf32> -> vector<16x128xf32>
    %c0_46 = arith.constant 0 : index
    %c0_47 = arith.constant 0 : index
    %c0_48 = arith.constant 0 : index
    %104 = vector.load %arg12[%c0_46, %c0_47, %c0_48] : memref<1x1x128xf32, #tpu.memory_space<vmem>>, vector<1x1x128xf32>
    %105 = vector.shape_cast %104 : vector<1x1x128xf32> to vector<1x128xf32>
    %106 = vector.broadcast %105 : vector<1x128xf32> to vector<16x128xf32>
    %107 = arith.addf %103, %106 : vector<16x128xf32>
    %cst_49 = arith.constant 5.000000e-01 : f32
    %108 = vector.broadcast %cst_49 : f32 to vector<16x128xf32>
    %109 = arith.mulf %108, %107 : vector<16x128xf32>
    %cst_50 = arith.constant 4.471500e-02 : f32
    %110 = vector.broadcast %cst_50 : f32 to vector<16x128xf32>
    %111 = arith.mulf %110, %107 : vector<16x128xf32>
    %112 = arith.mulf %111, %107 : vector<16x128xf32>
    %113 = arith.mulf %112, %107 : vector<16x128xf32>
    %114 = arith.addf %107, %113 : vector<16x128xf32>
    %cst_51 = arith.constant 0.797884583 : f32
    %115 = vector.broadcast %cst_51 : f32 to vector<16x128xf32>
    %116 = arith.mulf %115, %114 : vector<16x128xf32>
    %117 = math.tanh %116 : vector<16x128xf32>
    %cst_52 = arith.constant 1.000000e+00 : f32
    %118 = vector.broadcast %cst_52 : f32 to vector<16x128xf32>
    %119 = arith.addf %118, %117 : vector<16x128xf32>
    %120 = arith.mulf %109, %119 : vector<16x128xf32>
    %c0_53 = arith.constant 0 : index
    %c0_54 = arith.constant 0 : index
    %c0_55 = arith.constant 0 : index
    %121 = vector.load %arg13[%c0_53, %c0_54, %c0_55] : memref<1x128x32xbf16, #tpu.memory_space<vmem>>, vector<1x128x32xbf16>
    %122 = vector.shape_cast %121 : vector<1x128x32xbf16> to vector<128x32xbf16>
    %123 = arith.truncf %120 : vector<16x128xf32> to vector<16x128xbf16>
    %cst_56 = arith.constant dense<0.000000e+00> : vector<16x32xf32>
    %124 = tpu.matmul %123, %122, %cst_56 {dimension_numbers = #tpu.dot_dimension_numbers<[1], [0], [0], [1], [0, 0, 1, 1], [], []>} : vector<16x128xbf16>, vector<128x32xbf16>, vector<16x32xf32> -> vector<16x32xf32>
    %c0_57 = arith.constant 0 : index
    %c0_58 = arith.constant 0 : index
    %c0_59 = arith.constant 0 : index
    %125 = vector.load %arg14[%c0_57, %c0_58, %c0_59] : memref<1x1x32xf32, #tpu.memory_space<vmem>>, vector<1x1x32xf32>
    %126 = vector.shape_cast %125 : vector<1x1x32xf32> to vector<1x32xf32>
    %127 = vector.broadcast %126 : vector<1x32xf32> to vector<16x32xf32>
    %128 = arith.addf %124, %127 : vector<16x32xf32>
    %129 = arith.addf %73, %128 : vector<16x32xf32>
    %c0_60 = arith.constant 0 : index
    %c0_61 = arith.constant 0 : index
    %c0_62 = arith.constant 0 : index
    %130 = vector.load %arg15[%c0_60, %c0_61, %c0_62] : memref<1x16x32xf32, #tpu.memory_space<vmem>>, vector<1x16x32xf32>
    %131 = vector.shape_cast %130 : vector<1x16x32xf32> to vector<16x32xf32>
    %132 = vector.shape_cast %129 : vector<16x32xf32> to vector<1x16x32xf32>
    tpu.vector_store %arg15[%c0_60, %c0_61, %c0_62], %132 {strides = array<i32>} : memref<1x16x32xf32, #tpu.memory_space<vmem>>, vector<1x16x32xf32>,
    return
  }
  func.func @transform_0(%arg0: i32, %arg1: i32) -> (i32, i32, i32) {
    %c0_i32 = arith.constant 0 : i32
    %c0_i32_0 = arith.constant 0 : i32
    %c0_i32_1 = arith.constant 0 : i32
    return %arg0, %c0_i32, %c0_i32_0 : i32, i32, i32
  }
  func.func @transform_1(%arg0: i32, %arg1: i32) -> (i32, i32, i32) {
    %c0_i32 = arith.constant 0 : i32
    %c0_i32_0 = arith.constant 0 : i32
    %c0_i32_1 = arith.constant 0 : i32
    return %arg1, %c0_i32, %c0_i32_0 : i32, i32, i32
  }
  func.func @transform_2(%arg0: i32, %arg1: i32) -> (i32, i32, i32) {
    %c0_i32 = arith.constant 0 : i32
    %c0_i32_0 = arith.constant 0 : i32
    %c0_i32_1 = arith.constant 0 : i32
    return %arg1, %c0_i32, %c0_i32_0 : i32, i32, i32
  }
  func.func @transform_3(%arg0: i32, %arg1: i32) -> (i32, i32, i32) {
    %c0_i32 = arith.constant 0 : i32
    %c0_i32_0 = arith.constant 0 : i32
    %c0_i32_1 = arith.constant 0 : i32
    return %arg1, %c0_i32, %c0_i32_0 : i32, i32, i32
  }
  func.func @transform_4(%arg0: i32, %arg1: i32) -> (i32, i32, i32) {
    %c0_i32 = arith.constant 0 : i32
    %c0_i32_0 = arith.constant 0 : i32
    %c0_i32_1 = arith.constant 0 : i32
    return %arg1, %c0_i32, %c0_i32_0 : i32, i32, i32
  }
  func.func @transform_5(%arg0: i32, %arg1: i32) -> (i32, i32, i32) {
    %c0_i32 = arith.constant 0 : i32
    %c0_i32_0 = arith.constant 0 : i32
    %c0_i32_1 = arith.constant 0 : i32
    return %arg1, %c0_i32, %c0_i32_0 : i32, i32, i32
  }
  func.func @transform_6(%arg0: i32, %arg1: i32) -> (i32, i32, i32) {
    %c0_i32 = arith.constant 0 : i32
    %c0_i32_0 = arith.constant 0 : i32
    %c0_i32_1 = arith.constant 0 : i32
    return %arg1, %c0_i32, %c0_i32_0 : i32, i32, i32
  }
  func.func @transform_7(%arg0: i32, %arg1: i32) -> (i32, i32, i32) {
    %c0_i32 = arith.constant 0 : i32
    %c0_i32_0 = arith.constant 0 : i32
    %c0_i32_1 = arith.constant 0 : i32
    return %arg1, %c0_i32, %c0_i32_0 : i32, i32, i32
  }
  func.func @transform_8(%arg0: i32, %arg1: i32) -> (i32, i32, i32) {
    %c0_i32 = arith.constant 0 : i32
    %c0_i32_0 = arith.constant 0 : i32
    %c0_i32_1 = arith.constant 0 : i32
    return %arg1, %c0_i32, %c0_i32_0 : i32, i32, i32
  }
  func.func @transform_9(%arg0: i32, %arg1: i32) -> (i32, i32, i32) {
    %c0_i32 = arith.constant 0 : i32
    %c0_i32_0 = arith.constant 0 : i32
    %c0_i32_1 = arith.constant 0 : i32
    return %arg1, %c0_i32, %c0_i32_0 : i32, i32, i32
  }
  func.func @transform_10(%arg0: i32, %arg1: i32) -> (i32, i32, i32) {
    %c0_i32 = arith.constant 0 : i32
    %c0_i32_0 = arith.constant 0 : i32
    %c0_i32_1 = arith.constant 0 : i32
    return %arg1, %c0_i32, %c0_i32_0 : i32, i32, i32
  }
  func.func @transform_11(%arg0: i32, %arg1: i32) -> (i32, i32, i32) {
    %c0_i32 = arith.constant 0 : i32
    %c0_i32_0 = arith.constant 0 : i32
    %c0_i32_1 = arith.constant 0 : i32
    return %arg1, %c0_i32, %c0_i32_0 : i32, i32, i32
  }
  func.func @transform_12(%arg0: i32, %arg1: i32) -> (i32, i32, i32) {
    %c0_i32 = arith.constant 0 : i32
    %c0_i32_0 = arith.constant 0 : i32
    %c0_i32_1 = arith.constant 0 : i32
    return %arg1, %c0_i32, %c0_i32_0 : i32, i32, i32
  }
  func.func @transform_13(%arg0: i32, %arg1: i32) -> (i32, i32, i32) {
    %c0_i32 = arith.constant 0 : i32
    %c0_i32_0 = arith.constant 0 : i32
    %c0_i32_1 = arith.constant 0 : i32
    return %arg0, %c0_i32, %c0_i32_0 : i32, i32, i32
  }
}

module attributes {stable_mosaic.version = 11 : i64} {
  func.func @_norm_linear_kernel(%arg0: i32, %arg1: memref<16x32xf32, #tpu.memory_space<vmem>>, %arg2: memref<1x32xf32, #tpu.memory_space<vmem>>, %arg3: memref<1x32xf32, #tpu.memory_space<vmem>>, %arg4: memref<32x64xbf16, #tpu.memory_space<vmem>>, %arg5: memref<1x64xf32, #tpu.memory_space<vmem>>, %arg6: memref<16x64xf32, #tpu.memory_space<vmem>>) attributes {dimension_semantics = [#tpu.dimension_semantics<parallel>], iteration_bounds = array<i64: 1>, scalar_prefetch = 0 : i64, scratch_operands = 0 : i64, tpu.core_type = #tpu.core_type<tc>, window_params = [{transform_indices = @transform_0, window_bounds = array<i64: 16, 32>}, {pipeline_mode = #tpu.pipeline_mode<synchronous>, transform_indices = @transform_1, window_bounds = array<i64: 1, 32>}, {pipeline_mode = #tpu.pipeline_mode<synchronous>, transform_indices = @transform_2, window_bounds = array<i64: 1, 32>}, {pipeline_mode = #tpu.pipeline_mode<synchronous>, transform_indices = @transform_3, window_bounds = array<i64: 32, 64>}, {pipeline_mode = #tpu.pipeline_mode<synchronous>, transform_indices = @transform_4, window_bounds = array<i64: 1, 64>}, {transform_indices = @transform_5, window_bounds = array<i64: 16, 64>}]} {
    %c0 = arith.constant 0 : index
    %c0_0 = arith.constant 0 : index
    %0 = vector.load %arg1[%c0, %c0_0] : memref<16x32xf32, #tpu.memory_space<vmem>>, vector<16x32xf32>
    %c0_1 = arith.constant 0 : index
    %c0_2 = arith.constant 0 : index
    %1 = vector.load %arg2[%c0_1, %c0_2] : memref<1x32xf32, #tpu.memory_space<vmem>>, vector<1x32xf32>
    %c0_3 = arith.constant 0 : index
    %c0_4 = arith.constant 0 : index
    %2 = vector.load %arg3[%c0_3, %c0_4] : memref<1x32xf32, #tpu.memory_space<vmem>>, vector<1x32xf32>
    %cst = arith.constant dense<0.000000e+00> : vector<16xf32>
    %3 = vector.multi_reduction <add>, %0, %cst [1] : vector<16x32xf32> to vector<16xf32>
    %4 = vector.shape_cast %3 : vector<16xf32> to vector<16x1xf32>
    %cst_5 = arith.constant 3.200000e+01 : f32
    %5 = vector.broadcast %cst_5 : f32 to vector<16x1xf32>
    %6 = arith.divf %4, %5 : vector<16x1xf32>
    %7 = vector.broadcast %6 : vector<16x1xf32> to vector<16x32xf32>
    %8 = arith.subf %0, %7 : vector<16x32xf32>
    %9 = arith.mulf %8, %8 : vector<16x32xf32>
    %cst_6 = arith.constant dense<0.000000e+00> : vector<16xf32>
    %10 = vector.multi_reduction <add>, %9, %cst_6 [1] : vector<16x32xf32> to vector<16xf32>
    %11 = vector.shape_cast %10 : vector<16xf32> to vector<16x1xf32>
    %cst_7 = arith.constant 3.200000e+01 : f32
    %12 = vector.broadcast %cst_7 : f32 to vector<16x1xf32>
    %13 = arith.divf %11, %12 : vector<16x1xf32>
    %14 = vector.broadcast %6 : vector<16x1xf32> to vector<16x32xf32>
    %15 = arith.subf %0, %14 : vector<16x32xf32>
    %cst_8 = arith.constant 9.99999974E-6 : f32
    %16 = vector.broadcast %cst_8 : f32 to vector<16x1xf32>
    %17 = arith.addf %13, %16 : vector<16x1xf32>
    %18 = math.rsqrt %17 : vector<16x1xf32>
    %19 = vector.broadcast %18 : vector<16x1xf32> to vector<16x32xf32>
    %20 = arith.mulf %15, %19 : vector<16x32xf32>
    %21 = vector.broadcast %1 : vector<1x32xf32> to vector<16x32xf32>
    %22 = arith.mulf %20, %21 : vector<16x32xf32>
    %23 = vector.broadcast %2 : vector<1x32xf32> to vector<16x32xf32>
    %24 = arith.addf %22, %23 : vector<16x32xf32>
    %c0_9 = arith.constant 0 : index
    %c0_10 = arith.constant 0 : index
    %25 = vector.load %arg4[%c0_9, %c0_10] : memref<32x64xbf16, #tpu.memory_space<vmem>>, vector<32x64xbf16>
    %26 = arith.truncf %24 : vector<16x32xf32> to vector<16x32xbf16>
    %cst_11 = arith.constant dense<0.000000e+00> : vector<16x64xf32>
    %27 = tpu.matmul %26, %25, %cst_11 {dimension_numbers = #tpu.dot_dimension_numbers<[1], [0], [0], [1], [0, 0, 1, 1], [], []>} : vector<16x32xbf16>, vector<32x64xbf16>, vector<16x64xf32> -> vector<16x64xf32>
    %c0_12 = arith.constant 0 : index
    %c0_13 = arith.constant 0 : index
    %28 = vector.load %arg5[%c0_12, %c0_13] : memref<1x64xf32, #tpu.memory_space<vmem>>, vector<1x64xf32>
    %29 = vector.broadcast %28 : vector<1x64xf32> to vector<16x64xf32>
    %30 = arith.addf %27, %29 : vector<16x64xf32>
    %c0_14 = arith.constant 0 : index
    %c0_15 = arith.constant 0 : index
    %31 = vector.load %arg6[%c0_14, %c0_15] : memref<16x64xf32, #tpu.memory_space<vmem>>, vector<16x64xf32>
    tpu.vector_store %arg6[%c0_14, %c0_15], %30 {strides = array<i32>} : memref<16x64xf32, #tpu.memory_space<vmem>>, vector<16x64xf32>,
    return
  }
  func.func @transform_0(%arg0: i32) -> (i32, i32) {
    %c0_i32 = arith.constant 0 : i32
    %c0_i32_0 = arith.constant 0 : i32
    return %arg0, %c0_i32 : i32, i32
  }
  func.func @transform_1(%arg0: i32) -> (i32, i32) {
    %c0_i32 = arith.constant 0 : i32
    %c0_i32_0 = arith.constant 0 : i32
    %c0_i32_1 = arith.constant 0 : i32
    return %c0_i32, %c0_i32_0 : i32, i32
  }
  func.func @transform_2(%arg0: i32) -> (i32, i32) {
    %c0_i32 = arith.constant 0 : i32
    %c0_i32_0 = arith.constant 0 : i32
    %c0_i32_1 = arith.constant 0 : i32
    return %c0_i32, %c0_i32_0 : i32, i32
  }
  func.func @transform_3(%arg0: i32) -> (i32, i32) {
    %c0_i32 = arith.constant 0 : i32
    %c0_i32_0 = arith.constant 0 : i32
    %c0_i32_1 = arith.constant 0 : i32
    return %c0_i32, %c0_i32_0 : i32, i32
  }
  func.func @transform_4(%arg0: i32) -> (i32, i32) {
    %c0_i32 = arith.constant 0 : i32
    %c0_i32_0 = arith.constant 0 : i32
    %c0_i32_1 = arith.constant 0 : i32
    return %c0_i32, %c0_i32_0 : i32, i32
  }
  func.func @transform_5(%arg0: i32) -> (i32, i32) {
    %c0_i32 = arith.constant 0 : i32
    %c0_i32_0 = arith.constant 0 : i32
    return %arg0, %c0_i32 : i32, i32
  }
}

</mosaic_0001>

<bundles_post_ra>
// kernel: predictor_forward.3
= control target key start
LH: loop header
LB: loop body
LE: loop exit
PB: predicated region body
PF: predicated region fallthrough
CT: control target
= control target key end

     0   :  { %v138_v0 = vmov 0.0   ;;  %vm139_vm0 = vmmov 0   ;;  %vm57_vm1 = vcmask 523264   ;;  %vm102_vm2 = vcmask 261120   ;;  %s187_s1 = inlined_call_operand.vmem [shape: bf16[64,32], index: 1, kind: input, shape index: {}]   ;;  %s188_s0 = inlined_call_operand.vmem [shape: f32[16,64], index: 0, kind: input, shape index: {}]   ;;  %s189_s2 = inlined_call_operand.vmem [shape: f32[1,32], index: 2, kind: input, shape index: {}]   ;;  %s190_s3 = inlined_call_operand.vmem [shape: f32[16,32], index: 3, kind: output, shape index: {}]  }
   0x1   :  { %120 = vmatprep.subr.bf16.mxu0 %v138_v0  ;;  %v134_v1 = vld [vmem:[%s187_s1 + $0x18] sm:$0xff]   ;;  %128 = vmatprep.mubr.msk.bf16.mxu0 %vm139_vm0, %v138_v0  ;;  %v135_v2 = vld [vmem:[%s187_s1 + $0x10] sm:$0xff]   ;;  %v136_v3 = vld [vmem:[%s187_s1 + $0x8] sm:$0xff]  }
   0x2   :  { %121 = vmatpush3.bf16.msra.mxu0 %v134_v1  ;;  %v137_v4 = vld [vmem:[%s187_s1] sm:$0xff]   ;;  %v16_v6 = vld [vmem:[%s188_s0 + $0x8] sm:$0xff] }
   0x3   :  { %122 = vmatprep.subr.bf16.mxu0 %v138_v0  ;;  %v15_v5 = vld [vmem:[%s188_s0] sm:$0xff] }
   0x4   :  { %v25_v7 = vpack.c.bf16 %v16_v6, %v15_v5  ;;  %v109_v8 = vld [vmem:[%s189_s2] ss:$0 sm:$0xff] }
   0x6   :  { %123 = vmatpush3.bf16.msra.mxu0 %v135_v2 }
   0x7   :  { %124 = vmatprep.subr.bf16.mxu0 %v138_v0 }
   0xa   :  { %125 = vmatpush3.bf16.msra.mxu0 %v136_v3 }
   0xb   :  { %126 = vmatprep.subr.bf16.mxu0 %v138_v0 }
   0xe   :  { %127 = vmatpush3.bf16.msra.mxu0 %v137_v4 }
  0x11   :  { %129 = vmatmul.mubr.msk.bf16.vlgmr.msra.gmra.mxu0 %vm57_vm1, %v25_v7 }
  0xd1   :  { %v95_v9 = vpop.f32.mrf.mxu0 }
  0xd2   :  { %v96_v10 = vadd.f32 %v109_v8, %v95_v9 }
  0xd3   :  { %v130_v11 = vpop.f32.mrf.mxu0 }
  0xd4   :  { %103 = vst.msk [vmem:[%s190_s3] sm:$0xff] %vm102_vm2, %v96_v10 }
  0xd5   :  { %v98_v12 = vpop.f32.mrf.mxu0 }
  0xd6   :  { %v99_v13 = vadd.f32 %v109_v8, %v98_v12 }
  0xd7   :  { %v131_v14 = vpop.f32.mrf.mxu0 }
  0xd8   :  { %104 = vst.msk [vmem:[%s190_s3 + $0x8] sm:$0xff] %vm102_vm2, %v99_v13 }

// kernel: predictor_forward.5
= control target key start
LH: loop header
LB: loop body
LE: loop exit
PB: predicated region body
PF: predicated region fallthrough
CT: control target
= control target key end

     0   :  { %vm26_vm0 = vcmask 261120   ;;  %s271_s0 = inlined_call_operand.vmem [shape: f32[16,32], index: 0, kind: input, shape index: {}]   ;;  %s272_s1 = inlined_call_operand.vmem [shape: f32[1,32], index: 1, kind: input, shape index: {}]   ;;  %s273_s2 = inlined_call_operand.vmem [shape: f32[1,32], index: 2, kind: input, shape index: {}]   ;;  %s274_s3 = inlined_call_operand.vmem [shape: bf16[32,64], index: 3, kind: input, shape index: {}]   ;;  %s275_s4 = inlined_call_operand.vmem [shape: f32[1,64], index: 4, kind: input, shape index: {}]   ;;  %s276_s5 = inlined_call_operand.hbm [shape: f32[16,64], index: 5, kind: output, shape index: {}]  }
   0x1   :  { %v22_v0 = vld [vmem:[%s271_s0] sm:$0xff]  ;;  %v23_v1 = vld [vmem:[%s271_s0 + $0x8] sm:$0xff] }
   0x2   :  { %v27_v2 = vsel %vm26_vm0, %v22_v0, 0.0 }
   0x3   :  { %28 = vadd.xlane.f32.xlu0 %v27_v2 }
   0x4   :  { %10 = vsyncpa [#allocation3], 0  ;;  %v30_v3 = vsel %vm26_vm0, %v23_v1, 0.0  ;;  %v179_v14 = vld [vmem:[%s274_s3 + $0x8] sm:$0xff]   ;;  %v207_v15 = vmov 0.0   ;;  %vm208_vm1 = vmmov 0  }
   0x5   :  { %166 = vmatprep.subr.bf16.mxu0 %v207_v15  ;;  %170 = vmatprep.mubr.msk.bf16.mxu0 %vm208_vm1, %v207_v15  ;;  %v180_v16 = vld [vmem:[%s274_s3] sm:$0xff]   ;;  %vm138_vm2 = vcmask 523264  }
   0x6   :  { %167 = vmatpush3.bf16.msra.mxu0 %v179_v14  ;;  %v157_v25 = vld [vmem:[%s272_s1] ss:$0 sm:$0xff]  ;;  %s209_s1 = smov [#allocation2]  }
   0x7   :  { %31 = vadd.xlane.f32.xlu0 %v30_v3  ;;  %168 = vmatprep.subr.bf16.mxu0 %v207_v15  ;;  %v158_v29 = vld [vmem:[%s273_s2] ss:$0 sm:$0xff]  ;;  %s146_s30 = sshll.u32 %s209_s1, 4  ;;  %s147_s30 = int_to_ptr.vmem [resolvable:$true] %s146_s30 }
   0x8   :  { %v159_v34 = vld [vmem:[%s275_s4] ss:$0 sm:$0xff]  ;;  %s185_s2 = scalar_lea.vmem %s147_s30, 256  ;;  %p190_p1 = scmp.lt.s32.totalorder %s147_s30, %s147_s30 }
   0x9   :  { %p186_p0 = scmp.ne.s32.totalorder %s147_s30, %s185_s2  ;;  %p191_p2 = scmp.lt.s32.totalorder %s185_s2, %s185_s2 }
   0xa   :  { %169 = vmatpush3.bf16.msra.mxu0 %v180_v16 }
   0xb   :  { %p192_p3 = por %p191_p2, %p190_p1 }
   0xd   :  { %p193_p4 = pnand %p192_p3, %p186_p0 }
  0x8c   :  { %v29_v4 = vpop.xlane.xlu0 %28 }
  0x8d   :  { %v34_v5 = vmul.f32 0.03125, %v29_v4 }
  0x8f   :  { %v36_v6 = vsub.f32 %v22_v0, %v34_v5 }
  0x90   :  { %v32_v7 = vpop.xlane.xlu0 %31 }
  0x91   :  { %v35_v8 = vmul.f32 0.03125, %v32_v7  ;;  %v38_v9 = vmul.f32 %v36_v6, %v36_v6 }
  0x93   :  { %v37_v10 = vsub.f32 %v23_v1, %v35_v8  ;;  %v40_v11 = vsel %vm26_vm0, %v38_v9, 0.0 }
  0x94   :  { %41 = vadd.xlane.f32.xlu1 %v40_v11 }
  0x95   :  { %v39_v12 = vmul.f32 %v37_v10, %v37_v10 }
  0x97   :  { %v43_v13 = vsel %vm26_vm0, %v39_v12, 0.0 }
  0x98   :  { %44 = vadd.xlane.f32.xlu1 %v43_v13 }
 0x11d   :  { %v42_v17 = vpop.xlane.xlu1 %41 }
 0x11e   :  { %v46_v18 = vmul.f32 0.03125, %v42_v17 }
 0x120   :  { %v48_v19 = vadd.f32 1e-05, %v46_v18 }
 0x121   :  { %v45_v20 = vpop.xlane.xlu1 %44 }
 0x122   :  { %181 = vrsqrt.f32 %v48_v19  ;;  %v47_v21 = vmul.f32 0.03125, %v45_v20 }
 0x124   :  { %v49_v22 = vadd.f32 1e-05, %v47_v21 }
 0x126   :  { %183 = vrsqrt.f32 %v49_v22 }
 0x12f   :  { %v182_v23 = vpop.eup %181 }
 0x130   :  { %v52_v24 = vmul.f32 %v182_v23, %v36_v6 }
 0x132   :  { %v60_v28 = vmul.f32 %v157_v25, %v52_v24 }
 0x133   :  { %v184_v26 = vpop.eup %183 }
 0x134   :  { %v53_v27 = vmul.f32 %v184_v26, %v37_v10  ;;  %v68_v31 = vadd.f32 %v158_v29, %v60_v28 }
 0x136   :  { %v61_v30 = vmul.f32 %v157_v25, %v53_v27 }
 0x138   :  { %v69_v32 = vadd.f32 %v158_v29, %v61_v30 }
 0x13a   :  { %v74_v33 = vpack.c.bf16 %v69_v32, %v68_v31 }
 0x13c   :  { %171 = vmatmul.mubr.msk.bf16.vlgmr.msra.gmra.mxu0 %vm26_vm0, %v74_v33 }
 0x1fc   :  { %v131_v35 = vpop.f32.mrf.mxu0 }
 0x1fd   :  { %v132_v36 = vadd.f32 %v159_v34, %v131_v35 }
 0x1fe   :  { %v172_v37 = vpop.f32.mrf.mxu0 }
 0x1ff   :  { %139 = vst.msk [vmem:[#allocation2] sm:$0xff] %vm138_vm2, %v132_v36 }
 0x200   :  { %v134_v38 = vpop.f32.mrf.mxu0 }
 0x201   :  { %v135_v39 = vadd.f32 %v159_v34, %v134_v38 }
 0x202   :  { %v173_v40 = vpop.f32.mrf.mxu0 }
 0x203   :  { %140 = vst.msk [vmem:[#allocation2 + $0x8] sm:$0xff] %vm138_vm2, %v135_v39 }
 0x204   :  { %196 = shalt.err (!%p193_p4)
}
 0x205   :  { %s210_s4 = smov 128   ;;  %s211_s6 = smov 8  }
 0x206   :  { %152 = dma.vmem_to_hbm [thread:$0]  %s147_s30, 256, %s276_s5, [#allocation3], %s210_s4, %s210_s4, %s211_s6  }
 0x207   :  { %205 = dma.done.wait [#allocation3], 256  }
 0x208   :  { %206 = vsyncadd [#allocation3], 4294967040 }
 0x209   :  { %156 = vsyncpa [#allocation3], 1 }

// kernel: predictor_forward.4
= control target key start
LH: loop header
LB: loop body
LE: loop exit
PB: predicated region body
PF: predicated region fallthrough
CT: control target
= control target key end

     0   :  { %s3519_s25 = smov 0   ;;  %s3521_s26 = smov 0   ;;  %s4087_s0 = inlined_call_operand.vmem [shape: f32[2,16,32], index: 0, kind: input, shape index: {}]   ;;  %s4088_s1 = inlined_call_operand.vmem [shape: f32[2,1,32], index: 1, kind: input, shape index: {}]   ;;  %s4089_s2 = inlined_call_operand.vmem [shape: f32[2,1,32], index: 2, kind: input, shape index: {}]   ;;  %s4090_s3 = inlined_call_operand.vmem [shape: bf16[2,32,96], index: 3, kind: input, shape index: {}]   ;;  %s4091_s4 = inlined_call_operand.vmem [shape: f32[2,1,96], index: 4, kind: input, shape index: {}]   ;;  %s4092_s5 = inlined_call_operand.vmem [shape: bf16[2,32,32], index: 5, kind: input, shape index: {}]   ;;  %s4093_s6 = inlined_call_operand.vmem [shape: f32[2,1,32], index: 6, kind: input, shape index: {}]   ;;  %s4094_s7 = inlined_call_operand.vmem [shape: f32[2,1,32], index: 7, kind: input, shape index: {}]   ;;  %s4095_s8 = inlined_call_operand.vmem [shape: f32[2,1,32], index: 8, kind: input, shape index: {}]   ;;  %s4096_s9 = inlined_call_operand.vmem [shape: bf16[2,32,128], index: 9, kind: input, shape index: {}]   ;;  %s4097_s10 = inlined_call_operand.vmem [shape: f32[2,1,128], index: 10, kind: input, shape index: {}]   ;;  %s4098_s11 = inlined_call_operand.vmem [shape: bf16[2,128,32], index: 11, kind: input, shape index: {}]   ;;  %s4099_s12 = inlined_call_operand.vmem [shape: f32[2,1,32], index: 12, kind: input, shape index: {}]   ;;  %s4100_s13 = inlined_call_operand.vmem [shape: f32[2,16,32], index: 13, kind: output, shape index: {}]  }
   0x1   :  { %4105 = sst [smem:[#allocation8_spill]] %s4087_s0  ;;  %s3523_s27 = smov 0  }
   0x2   :  { %4106 = sst [smem:[#allocation9_spill]] %s4089_s2  ;;  %s3525_s28 = smov 0  }
   0x3   :  { %4107 = sst [smem:[#allocation10_spill]] %s4090_s3  ;;  %s3527_s29 = smov 0  }
   0x4   :  { %4108 = sst [smem:[#allocation11_spill]] %s4092_s5 }
   0x5   :  { %4109 = sst [smem:[#allocation12_spill]] %s4100_s13 }
   0x6 LB: > { %4110 = sst [smem:[#allocation2_spill]] %s3419_s25  ;;  %s32_s30 = sadd.s32 1, %s3427_s27  ;;  %s3435_s29 = sphi %s3527_s29, %s23_s29   ;;  %s3431_s28 = sphi %s3525_s28, %s4133_s28   ;;  %s3427_s27 = sphi %s3523_s27, %s4132_s27   ;;  %s3423_s26 = sphi %s3521_s26, %s4131_s26   ;;  %s3419_s25 = sphi %s3519_s25, %s4130_s25  }
   0x7   : > { %4111 = sst [smem:[#allocation3_spill]] %s3427_s27  ;;  %s35_s14 = sadd.s32 1, %s3431_s28 }
   0x8   : > { %4112 = sst [smem:[#allocation4_spill]] %s3431_s28  ;;  %p33_p0 = scmp.ge.s32.totalorder %s32_s30, 2 }
   0x9   : > { %4113 = sst [smem:[#allocation5_spill]] %s3435_s29  ;;  %p3061_p1 = scmp.ge.s32.totalorder %s3435_s29, 1 }
   0xa   : > { %p503_p2 = scmp.lt.s32.totalorder %s3435_s29, 5  ;;  %s4135_s30 = smov (%p33_p0, %s32_s30), 0 }
   0xb   : > { %4114 = sst [smem:[#allocation6_spill]] %s4135_s30  ;;  %s4137_s14 = smov (!%p33_p0, %s35_s14), %s3431_s28 }
   0xc   : > { %p504_p3 = pnand %p3061_p1, %p503_p2  ;;  %p37_p4 = scmp.ge.s32.totalorder %s4137_s14, 2 }
   0xd   : > { %p591_p5 = scmp.lt.s32.totalorder (!%p504_p3), %s3423_s26, 1  ;;  %p596_p6 = scmp.lt.s32.totalorder (!%p504_p3), %s3419_s25, 1 }
   0xe   : > { %s4139_s14 = smov (%p37_p4, %s4137_s14), 0  ;;  %507 = sbr.rel (%p504_p3) target bundleno = 2653 (0xa5d), region = 72 }
   0xf   : > { %4115 = sst [smem:[#allocation7_spill]] %s4139_s14 }
  0x10   : > { %s4116_s0 = sld [smem:[#allocation8_spill]] (!%p504_p3) }
  0x11   : > { %s4118_s3 = sld [smem:[#allocation10_spill]] (!%p504_p3) }
  0x12   : > { %s4119_s5 = sld [smem:[#allocation11_spill]] (!%p504_p3) }
  0x13   : > { %s4141_s26 = smov (!%p591_p5, %s3423_s26), 1 }
  0x14   : > { %s3553_s15 = scalar_select %p596_p6, %s3419_s25, 1 }
  0x15   : > { %s3126_s16 = sshll.u32 %s4141_s26, 4 }
  0x16   : > { %s595_s19 = scalar_lea.vmem %s4116_s0, %s3126_s16  ;;  %s3127_s30 = sshll.u32 %s3553_s15, 4 }
  0x17   : > { %s3570_s29 = scalar_lea.vmem %s4118_s3, %s3127_s30  ;;  %s3596_s26 = scalar_lea.vmem %s4096_s9, %s3127_s30 }
  0x18   : > { %s3579_s0 = scalar_lea.vmem %s4119_s5, %s3127_s30  ;;  %s631_s13 = scalar_lea.vmem %s4097_s10, %s3553_s15 }
  0x19   : > { %s3130_s5 = sshll.u32 %s3553_s15, 6  ;;  %s639_s23 = scalar_lea.vmem %s4099_s12, %s3553_s15 }
  0x1a   : > { %s3610_s22 = scalar_lea.vmem %s4098_s11, %s3130_s5  ;;  %s4120_s3 = sld [smem:[#allocation12_spill]] }
  0x1b   : > { %s4121_s30 = sld [smem:[#allocation2_spill]] }
  0x20   : > { %s3615_s2 = scalar_lea.vmem %s4120_s3, %s3126_s16 }
  0x21   : > { %p3074_p7 = scmp.ne.s32.totalorder %s4121_s30, 0 }
  0x23   : > { %649 = sbr.rel (%p3074_p7) target bundleno = 42 (0x2a), region = 76 }
  0x28   : > { %v650_v0 = vld [vmem:[%s595_s19] sm:$0xff]  ;;  %vm652_vm0 = vcmask 261120   ;;  %v651_v1 = vld [vmem:[%s595_s19 + $0x8] sm:$0xff] }
  0x29   : > { %653 = vst.msk [vmem:[%s3615_s2] sm:$0xff] %vm652_vm0, %v650_v0  ;;  %654 = vst.msk [vmem:[%s3615_s2 + $0x8] sm:$0xff] %vm652_vm0, %v651_v1 }
  0x2a PF: > { %vm659_vm1 = vcmask 261120   ;;  %v3337_v16 = vld [vmem:[%s3570_s29 + $0x8] sm:$0xff]   ;;  %v3437_v17 = vmov 0.0   ;;  %vm3438_vm2 = vmmov 0   ;;  %v3338_v18 = vld [vmem:[%s3570_s29] sm:$0xff]   ;;  %s4122_s29 = scalar_lea.vmem %s4088_s1, %s3553_s15  ;;  %s4123_s25 = sld [smem:[#allocation9_spill]]  ;;  %v796_v48 = vlaneseq }
  0x2b   : > { %3170 = vmatprep.subr.bf16.mxu0 %v3437_v17  ;;  %3174 = vmatprep.mubr.msk.bf16.mxu0 %vm3438_vm2, %v3437_v17  ;;  %v3075_v27 = vld [vmem:[%s4122_s29] ss:$0 sm:$0xff]  ;;  %s4125_s21 = scalar_lea.vmem %s4091_s4, %s3553_s15  ;;  %s3439_s14 = smov 112   ;;  %v3443_v46 = vmov 1983009808   ;;  %vm1663_vm3 = vcmask 64512  }
  0x2c   : > { %3171 = vmatpush3.bf16.msra.mxu0 %v3337_v16  ;;  %3190 = vmatprep.subr.bf16.mxu1 %v3437_v17  ;;  %v3077_v36 = vld [vmem:[%s4125_s21] ss:$0 sm:$0xff]  ;;  %s3440_s24 = smov 120   ;;  %s3441_s27 = smov 104   ;;  %v794_v47 = vunpack.c.l.s4 %v3443_v46  ;;  %v3444_v51 = vmov 1934713408  }
  0x2d   : > { %3172 = vmatprep.subr.bf16.mxu0 %v3437_v17  ;;  %3192 = vmatprep.mubr.msk.bf16.mxu1 %vm3438_vm2, %v3437_v17  ;;  %s3442_s28 = smov 96   ;;  %v826_v52 = vunpack.c.l.s4 %v3444_v51  ;;  %v797_v54 = vshrl.u32 %v796_v48, 7  ;;  %s3445_s30 = smov 64   ;;  %vm1852_vm4 = vcmask 130048   ;;  %vm2549_vm5 = vcmask 195584  }
  0x2e   : > { %v795_v53 = vunpack.c.0.s8 %v794_v47  ;;  %s3447_s3 = smov 8   ;;  %s3448_s5 = smov 24  }
  0x2f   : > { %v827_v58 = vunpack.c.0.s8 %v826_v52  ;;  %s4126_s19 = scalar_lea.vmem %s4093_s6, %s3553_s15  ;;  %s4128_s21 = scalar_lea.vmem %s4095_s8, %s3553_s15 }
  0x30   : > { %v655_v2 = vld [vmem:[%s3615_s2] sm:$0xff]  ;;  %v656_v3 = vld [vmem:[%s3615_s2 + $0x8] sm:$0xff]  ;;  %3173 = vmatpush3.bf16.msra.mxu0 %v3338_v18  ;;  %s4124_s17 = scalar_lea.vmem %s4123_s25, %s3553_s15  ;;  %v3677_v59 = vsub.s32 %v795_v53, %v797_v54 }
  0x31   : > { %v660_v4 = vsel %vm659_vm1, %v655_v2, 0.0  ;;  %v663_v5 = vsel %vm659_vm1, %v656_v3, 0.0  ;;  %3178 = vmatprep.subr.bf16.mxu0 %v3437_v17  ;;  %v3076_v31 = vld [vmem:[%s4124_s17] ss:$0 sm:$0xff] }
  0x32   : > { %661 = vadd.xlane.f32.xlu0 %v660_v4 }
  0x36   : > { %664 = vadd.xlane.f32.xlu0 %v663_v5 }
  0xbb   : > { %v662_v6 = vpop.xlane.xlu0 %661 }
  0xbc   : > { %v667_v7 = vmul.f32 0.03125, %v662_v6 }
  0xbe   : > { %v669_v8 = vsub.f32 %v655_v2, %v667_v7  ;;  %v3684_v2 = vsub.s32 %v827_v58, %v797_v54 }
  0xbf   : > { %v665_v9 = vpop.xlane.xlu0 %664 }
  0xc0   : > { %v668_v10 = vmul.f32 0.03125, %v665_v9  ;;  %v671_v11 = vmul.f32 %v669_v8, %v669_v8 }
  0xc2   : > { %v670_v12 = vsub.f32 %v656_v3, %v668_v10  ;;  %v673_v13 = vsel %vm659_vm1, %v671_v11, 0.0 }
  0xc3   : > { %674 = vadd.xlane.f32.xlu1 %v673_v13 }
  0xc4   : > { %v672_v14 = vmul.f32 %v670_v12, %v670_v12 }
  0xc6   : > { %v676_v15 = vsel %vm659_vm1, %v672_v14, 0.0 }
  0xc7   : > { %677 = vadd.xlane.f32.xlu1 %v676_v15 }
 0x14c   : > { %v675_v19 = vpop.xlane.xlu1 %674 }
 0x14d   : > { %v679_v20 = vmul.f32 0.03125, %v675_v19 }
 0x14f   : > { %v681_v21 = vadd.f32 1e-05, %v679_v20 }
 0x150   : > { %v678_v22 = vpop.xlane.xlu1 %677 }
 0x151   : > { %3351 = vrsqrt.f32 %v681_v21  ;;  %v680_v23 = vmul.f32 0.03125, %v678_v22 }
 0x153   : > { %v682_v24 = vadd.f32 1e-05, %v680_v23 }
 0x155   : > { %3353 = vrsqrt.f32 %v682_v24 }
 0x15e   : > { %v3352_v25 = vpop.eup %3351 }
 0x15f   : > { %v685_v26 = vmul.f32 %v3352_v25, %v669_v8 }
 0x161   : > { %v693_v30 = vmul.f32 %v3075_v27, %v685_v26 }
 0x162   : > { %v3354_v28 = vpop.eup %3353 }
 0x163   : > { %v686_v29 = vmul.f32 %v3354_v28, %v670_v12  ;;  %v701_v33 = vadd.f32 %v3076_v31, %v693_v30 }
 0x165   : > { %v694_v32 = vmul.f32 %v3075_v27, %v686_v29 }
 0x167   : > { %v702_v34 = vadd.f32 %v3076_v31, %v694_v32 }
 0x169   : > { %v707_v35 = vpack.c.bf16 %v702_v34, %v701_v33 }
 0x16b   : > { %3175 = vmatmul.mubr.msk.bf16.vlgmr.msra.gmra.mxu0 %vm659_vm1, %v707_v35 }
 0x16c   : > { %3180 = vmatprep.mubr.msk.bf16.mxu0 %vm3438_vm2, %v3437_v17 }
 0x22b   : > { %v764_v37 = vpop.f32.mrf.mxu0 }
 0x22c   : > { %v3654_v38 = vadd.f32 %v3077_v36, %v764_v37 }
 0x22d   : > { %v3176_v39 = vpop.f32.mrf.mxu0 }
 0x22e   : > { %779 = vrot.lane.b32.xlu1 %v3654_v38, %s3439_s14  ;;  %773 = vrot.lane.b32.xlu0 %v3654_v38, %s3440_s24 }
 0x22f   : > { %v767_v40 = vpop.f32.mrf.mxu0 }
 0x230   : > { %v768_v41 = vadd.f32 %v3077_v36, %v767_v40 }
 0x231   : > { %v3177_v42 = vpop.f32.mrf.mxu0 }
 0x232   : > { %785 = vrot.lane.b32.xlu0 %v3654_v38, %s3441_s27  ;;  %775 = vrot.lane.b32.xlu1 %v768_v41, %s3440_s24 }
 0x236   : > { %1063 = vrot.lane.b32.xlu0 %v3654_v38, %s3442_s28  ;;  %781 = vrot.lane.b32.xlu1 %v768_v41, %s3439_s14 }
 0x23a   : > { %787 = vrot.lane.b32.xlu1 %v768_v41, %s3441_s27 }
 0x23e   : > { %1065 = vrot.lane.b32.xlu1 %v768_v41, %s3442_s28 }
 0x2a0   : > { %v3662_v43 = vpop.permute.xlu1 %779  ;;  %v3664_v44 = vpop.permute.xlu0 %773 }
 0x2a1   : > { %1067 = vrot.lane.b32.xlu0 %v3664_v44, %s3442_s28  ;;  %v791_v34 = vcombine.low %v3654_v38, %v3662_v43  ;;  %v792_v35 = vcombine.high %v3654_v38, %v3662_v43 }
 0x2a3   : > { %v799_v39 = vrot.slane %v791_v34, %v3677_v59  ;;  %v806_v40 = vrot.slane %v792_v35, %v3677_v59 }
 0x2a4   : > { %v776_v45 = vpop.permute.xlu1 %775  ;;  %v3671_v49 = vpop.permute.xlu0 %785 }
 0x2a5   : > { %1071 = vrot.lane.b32.xlu0 %v3662_v43, %s3442_s28  ;;  %1069 = vrot.lane.b32.xlu1 %v776_v45, %s3442_s28  ;;  %v807_v32 = vcombine.low %v3664_v44, %v3671_v49  ;;  %v808_v33 = vcombine.high %v3664_v44, %v3671_v49 }
 0x2a7   : > { %v815_v36 = vrot.slane %v807_v32, %v3677_v59  ;;  %v822_v37 = vrot.slane %v808_v33, %v3677_v59 }
 0x2a8   : > { %v782_v50 = vpop.permute.xlu1 %781 }
 0x2a9   : > { %1075 = vrot.lane.b32.xlu0 %v3671_v49, %s3442_s28  ;;  %1073 = vrot.lane.b32.xlu1 %v782_v50, %s3442_s28  ;;  %v859_v55 = vcombine.low %v768_v41, %v782_v50  ;;  %v860_v56 = vcombine.high %v768_v41, %v782_v50  ;;  %v823_v42 = vcombine.low %v799_v39, %v815_v36 }
 0x2aa   : > { %v839_v46 = vcombine.low %v806_v40, %v822_v37  ;;  %v840_v47 = vcombine.high %v806_v40, %v822_v37 }
 0x2ab   : > { %v867_v62 = vrot.slane %v859_v55, %v3677_v59  ;;  %v874_v63 = vrot.slane %v860_v56, %v3677_v59  ;;  %v831_v51 = vrot.slane %v823_v42, %v3684_v2 }
 0x2ac   : > { %v788_v57 = vpop.permute.xlu1 %787  ;;  %v847_v53 = vrot.slane %v839_v46, %v3684_v2  ;;  %v854_v54 = vrot.slane %v840_v47, %v3684_v2 }
 0x2ad   : > { %1361 = vrot.lane.b32.xlu0 %v768_v41, %s3445_s30  ;;  %v875_v60 = vcombine.low %v776_v45, %v788_v57  ;;  %v876_v61 = vcombine.high %v776_v45, %v788_v57  ;;  %1077 = vrot.lane.b32.xlu1 %v788_v57, %s3442_s28  ;;  %v1064_v41 = vpop.permute.xlu0 %1063 }
 0x2af   : > { %v883_v0 = vrot.slane %v875_v60, %v3677_v59  ;;  %v890_v1 = vrot.slane %v876_v61, %v3677_v59  ;;  %v943_v60 = vcombine.low %v847_v53, %v854_v54  ;;  %v3082_v61 = vcombine.high %v847_v53, %v854_v54 }
 0x2b0   : > { %v1066_v48 = vpop.permute.xlu1 %1065 }
 0x2b1   : > { %v891_v3 = vcombine.low %v867_v62, %v883_v0  ;;  %v892_v4 = vcombine.high %v867_v62, %v883_v0  ;;  %v907_v5 = vcombine.low %v874_v63, %v890_v1  ;;  %v908_v6 = vcombine.high %v874_v63, %v890_v1  ;;  %1365 = vrot.lane.b32.xlu1 %v776_v45, %s3445_s30 }
 0x2b2   : > { %v824_v45 = vcombine.high %v799_v39, %v815_v36 }
 0x2b3   : > { %v899_v7 = vrot.slane %v891_v3, %v3684_v2  ;;  %v906_v8 = vrot.slane %v892_v4, %v3684_v2  ;;  %v915_v9 = vrot.slane %v907_v5, %v3684_v2  ;;  %v922_v10 = vrot.slane %v908_v6, %v3684_v2 }
 0x2b4   : > { %v838_v52 = vrot.slane %v824_v45, %v3684_v2 }
 0x2b5   : > { %v995_v11 = vcombine.low %v899_v7, %v906_v8  ;;  %v3083_v12 = vcombine.high %v899_v7, %v906_v8  ;;  %v1011_v13 = vcombine.low %v915_v9, %v922_v10  ;;  %v3084_v14 = vcombine.high %v915_v9, %v922_v10  ;;  %1369 = vrot.lane.b32.xlu1 %v782_v50, %s3445_s30 }
 0x2b6   : > { %v3081_v58 = vcombine.high %v831_v51, %v838_v52  ;;  %v3740_v7 = vrot.slane %v943_v60, %v3677_v59  ;;  %v3743_v8 = vrot.slane %v3082_v61, %v3677_v59 }
 0x2b7   : > { %v1002_v15 = vrot.slane %v995_v11, %v3677_v59  ;;  %v1010_v16 = vrot.slane %v3083_v12, %v3677_v59  ;;  %v1018_v18 = vrot.slane %v1011_v13, %v3677_v59  ;;  %v1026_v19 = vrot.slane %v3084_v14, %v3677_v59 }
 0x2b8   : > { %v3737_v6 = vrot.slane %v3081_v58, %v3677_v59 }
 0x2b9   : > { %v1027_v20 = vcombine.low %v1002_v15, %v1010_v16  ;;  %v1043_v21 = vcombine.low %v1018_v18, %v1026_v19  ;;  %1373 = vrot.lane.b32.xlu1 %v788_v57, %s3445_s30  ;;  %v1028_v22 = vcombine.high %v1002_v15, %v1010_v16  ;;  %v1044_v23 = vcombine.high %v1018_v18, %v1026_v19 }
 0x2ba   : > { %v927_v57 = vcombine.low %v831_v51, %v838_v52 }
 0x2bb   : > { %v3698_v24 = vrot.slane %v1027_v20, %v3684_v2  ;;  %v3701_v25 = vrot.slane %v1043_v21, %v3684_v2  ;;  %v3704_v26 = vrot.slane %v1028_v22, %v3684_v2  ;;  %v3707_v27 = vrot.slane %v1044_v23, %v3684_v2 }
 0x2bc   : > { %v3734_v5 = vrot.slane %v927_v57, %v3677_v59  ;;  %v975_v22 = vcombine.low %v3740_v7, %v3743_v8 }
 0x2bd   : > { %v1059_v28 = vcombine.low %v3698_v24, %v3701_v25  ;;  %v1061_v29 = vcombine.low %v3704_v26, %v3707_v27  ;;  %v1062_v30 = vcombine.high %v3704_v26, %v3707_v27  ;;  %v1060_v31 = vcombine.high %v3698_v24, %v3701_v25 }
 0x2be   : > { %v959_v21 = vcombine.low %v3734_v5, %v3737_v6 }
 0x313   : > { %v1068_v50 = vpop.permute.xlu0 %1067 }
 0x317   : > { %v1072_v55 = vpop.permute.xlu0 %1071  ;;  %v1070_v56 = vpop.permute.xlu1 %1069 }
 0x318   : > { %v1087_v62 = vcombine.low %v1064_v41, %v1072_v55  ;;  %v1088_v63 = vcombine.high %v1064_v41, %v1072_v55 }
 0x31a   : > { %v1095_v9 = vrot.slane %v1087_v62, %v3677_v59  ;;  %v1102_v10 = vrot.slane %v1088_v63, %v3677_v59 }
 0x31b   : > { %v1076_v0 = vpop.permute.xlu0 %1075  ;;  %v1074_v4 = vpop.permute.xlu1 %1073 }
 0x31c   : > { %v1103_v1 = vcombine.low %v1068_v50, %v1076_v0  ;;  %v1104_v3 = vcombine.high %v1068_v50, %v1076_v0  ;;  %v1155_v13 = vcombine.low %v1066_v48, %v1074_v4  ;;  %v1156_v14 = vcombine.high %v1066_v48, %v1074_v4 }
 0x31d   : > { %v976_v4 = vcombine.high %v3740_v7, %v3743_v8 }
 0x31e   : > { %v1111_v11 = vrot.slane %v1103_v1, %v3677_v59  ;;  %v1118_v12 = vrot.slane %v1104_v3, %v3677_v59  ;;  %v1163_v37 = vrot.slane %v1155_v13, %v3677_v59  ;;  %v1170_v39 = vrot.slane %v1156_v14, %v3677_v59 }
 0x31f   : > { %v1078_v20 = vpop.permute.xlu1 %1077  ;;  %v960_v3 = vcombine.high %v3734_v5, %v3737_v6 }
 0x320   : > { %v1119_v15 = vcombine.low %v1095_v9, %v1111_v11  ;;  %v1120_v16 = vcombine.high %v1095_v9, %v1111_v11  ;;  %v1135_v18 = vcombine.low %v1102_v10, %v1118_v12  ;;  %v1136_v19 = vcombine.high %v1102_v10, %v1118_v12  ;;  %v1362_v9 = vpop.permute.xlu0 %1361 }
 0x321   : > { %v1171_v23 = vcombine.low %v1070_v56, %v1078_v20  ;;  %v1172_v32 = vcombine.high %v1070_v56, %v1078_v20 }
 0x322   : > { %v1127_v33 = vrot.slane %v1119_v15, %v3684_v2  ;;  %v1134_v34 = vrot.slane %v1120_v16, %v3684_v2  ;;  %v1143_v35 = vrot.slane %v1135_v18, %v3684_v2  ;;  %v1150_v36 = vrot.slane %v1136_v19, %v3684_v2 }
 0x323   : > { %v1179_v40 = vrot.slane %v1171_v23, %v3677_v59  ;;  %v1186_v41 = vrot.slane %v1172_v32, %v3677_v59  ;;  %v1366_v48 = vpop.permute.xlu1 %1365 }
 0x324   : > { %v1223_v42 = vcombine.low %v1127_v33, %v1134_v34  ;;  %v3085_v45 = vcombine.high %v1127_v33, %v1134_v34  ;;  %v1239_v46 = vcombine.low %v1143_v35, %v1150_v36  ;;  %v3086_v47 = vcombine.high %v1143_v35, %v1150_v36 }
 0x325   : > { %v1187_v50 = vcombine.low %v1163_v37, %v1179_v40  ;;  %v1188_v51 = vcombine.high %v1163_v37, %v1179_v40  ;;  %v1203_v52 = vcombine.low %v1170_v39, %v1186_v41  ;;  %v1204_v53 = vcombine.high %v1170_v39, %v1186_v41 }
 0x326   : > { %v1230_v54 = vrot.slane %v1223_v42, %v3677_v59  ;;  %v1238_v55 = vrot.slane %v3085_v45, %v3677_v59  ;;  %v1246_v56 = vrot.slane %v1239_v46, %v3677_v59  ;;  %v1254_v57 = vrot.slane %v3086_v47, %v3677_v59 }
 0x327   : > { %v1195_v58 = vrot.slane %v1187_v50, %v3684_v2  ;;  %v1202_v60 = vrot.slane %v1188_v51, %v3684_v2  ;;  %v1211_v61 = vrot.slane %v1203_v52, %v3684_v2  ;;  %v1218_v62 = vrot.slane %v1204_v53, %v3684_v2  ;;  %v1370_v63 = vpop.permute.xlu1 %1369 }
 0x328   : > { %v1255_v0 = vcombine.low %v1230_v54, %v1238_v55  ;;  %v1271_v1 = vcombine.low %v1246_v56, %v1254_v57  ;;  %v1451_v14 = vcombine.low %v1362_v9, %v1370_v63  ;;  %v1452_v15 = vcombine.high %v1362_v9, %v1370_v63 }
 0x329   : > { %v1291_v10 = vcombine.low %v1195_v58, %v1202_v60  ;;  %v3087_v11 = vcombine.high %v1195_v58, %v1202_v60  ;;  %v1307_v12 = vcombine.low %v1211_v61, %v1218_v62  ;;  %v3088_v13 = vcombine.high %v1211_v61, %v1218_v62 }
 0x32a   : > { %v1256_v16 = vcombine.high %v1230_v54, %v1238_v55  ;;  %v1272_v18 = vcombine.high %v1246_v56, %v1254_v57  ;;  %v1459_v33 = vrot.slane %v1451_v14, %v3677_v59  ;;  %v1466_v34 = vrot.slane %v1452_v15, %v3677_v59 }
 0x32b   : > { %v1298_v19 = vrot.slane %v1291_v10, %v3677_v59  ;;  %v1306_v20 = vrot.slane %v3087_v11, %v3677_v59  ;;  %v1314_v23 = vrot.slane %v1307_v12, %v3677_v59  ;;  %v1322_v32 = vrot.slane %v3088_v13, %v3677_v59  ;;  %v1374_v35 = vpop.permute.xlu1 %1373 }
 0x32c   : > { %v1263_v36 = vrot.slane %v1255_v0, %v3684_v2  ;;  %v1279_v37 = vrot.slane %v1271_v1, %v3684_v2  ;;  %v1467_v39 = vcombine.low %v1366_v48, %v1374_v35  ;;  %v1468_v40 = vcombine.high %v1366_v48, %v1374_v35 }
 0x32d   : > { %v1323_v41 = vcombine.low %v1298_v19, %v1306_v20  ;;  %v1339_v42 = vcombine.low %v1314_v23, %v1322_v32  ;;  %v3782_v45 = vrot.slane %v1256_v16, %v3684_v2  ;;  %v3785_v46 = vrot.slane %v1272_v18, %v3684_v2 }
 0x32e   : > { %v1324_v47 = vcombine.high %v1298_v19, %v1306_v20  ;;  %v1340_v50 = vcombine.high %v1314_v23, %v1322_v32  ;;  %v1475_v51 = vrot.slane %v1467_v39, %v3677_v59  ;;  %v1482_v52 = vrot.slane %v1468_v40, %v3677_v59 }
 0x32f   : > { %v1331_v53 = vrot.slane %v1323_v41, %v3684_v2  ;;  %v1347_v54 = vrot.slane %v1339_v42, %v3684_v2  ;;  %v3801_v56 = vrot.slane %v959_v21, %v3684_v2  ;;  %v1287_v62 = vcombine.low %v1263_v36, %v1279_v37 }
 0x330   : > { %v3792_v48 = vrot.slane %v1324_v47, %v3684_v2  ;;  %v3795_v55 = vrot.slane %v1340_v50, %v3684_v2  ;;  %v1483_v57 = vcombine.low %v1459_v33, %v1475_v51  ;;  %v1484_v58 = vcombine.high %v1459_v33, %v1475_v51 }
 0x331   : > { %v1499_v60 = vcombine.low %v1466_v34, %v1482_v52  ;;  %v1500_v61 = vcombine.high %v1466_v34, %v1482_v52  ;;  %v1355_v63 = vcombine.low %v1331_v53, %v1347_v54  ;;  %v1289_v0 = vcombine.low %v3782_v45, %v3785_v46 }
 0x332   : > { %v1357_v1 = vcombine.low %v3792_v48, %v3795_v55  ;;  %v1491_v9 = vrot.slane %v1483_v57, %v3684_v2  ;;  %v1498_v10 = vrot.slane %v1484_v58, %v3684_v2  ;;  %v983_v12 = vrot.slane %v975_v22, %v3684_v2 }
 0x333   : > { %v1507_v5 = vrot.slane %v1499_v60, %v3684_v2  ;;  %v1514_v6 = vrot.slane %v1500_v61, %v3684_v2  ;;  %v1659_v21 = vpack.c.bf16 %v1355_v63, %v1287_v62  ;;  %v974_v13 = vrot.slane %v960_v3, %v3684_v2 }
 0x334   : > { %v1661_v11 = vpack.c.bf16 %v1357_v1, %v1289_v0  ;;  %v1587_v14 = vcombine.low %v1491_v9, %v1498_v10  ;;  %v3091_v15 = vcombine.high %v1491_v9, %v1498_v10  ;;  %v990_v23 = vrot.slane %v976_v4, %v3684_v2 }
 0x335   : > { %v1603_v16 = vcombine.low %v1507_v5, %v1514_v6  ;;  %v3092_v18 = vcombine.high %v1507_v5, %v1514_v6  ;;  %v1668_v19 = vsel %vm1663_vm3, %v1659_v21, 0  ;;  %v1356_v32 = vcombine.high %v1331_v53, %v1347_v54 }
 0x336   : > { %v1762_v20 = vsel %vm1663_vm3, %v1661_v11, 0  ;;  %v1594_v33 = vrot.slane %v1587_v14, %v3677_v59  ;;  %v1602_v34 = vrot.slane %v3091_v15, %v3677_v59  ;;  %3179 = vmatpush3.bf16.xpose.msra.mxu0 %v1668_v19  ;;  %v1288_v22 = vcombine.high %v1263_v36, %v1279_v37 }
 0x337   : > { %v1610_v7 = vrot.slane %v1603_v16, %v3677_v59  ;;  %v1618_v8 = vrot.slane %v3092_v18, %v3677_v59  ;;  %3191 = vmatpush3.bf16.xpose.msra.mxu1 %v1762_v20  ;;  %3184 = vmatprep.subr.bf16.mxu0 %v3437_v17  ;;  %v991_v40 = vcombine.low %v3801_v56, %v983_v12 }
 0x338   : > { %3202 = vmatprep.subr.mxu1 %v3437_v17  ;;  %v1619_v3 = vcombine.low %v1594_v33, %v1602_v34  ;;  %v1620_v39 = vcombine.high %v1594_v33, %v1602_v34  ;;  %v993_v41 = vcombine.low %v974_v13, %v990_v23  ;;  %v1660_v42 = vpack.c.bf16 %v1356_v32, %v1288_v22 }
 0x339   : > { %v1635_v35 = vcombine.low %v1610_v7, %v1618_v8  ;;  %v1636_v4 = vcombine.high %v1610_v7, %v1618_v8  ;;  %v1655_v36 = vpack.c.bf16 %v1059_v28, %v991_v40  ;;  %v1358_v60 = vcombine.high %v3792_v48, %v3795_v55 }
 0x33a   : > { %v1627_v47 = vrot.slane %v1619_v3, %v3684_v2  ;;  %v3829_v51 = vrot.slane %v1620_v39, %v3684_v2  ;;  %v1657_v37 = vpack.c.bf16 %v1061_v29, %v993_v41  ;;  %v1715_v58 = vsel %vm1663_vm3, %v1660_v42, 0 }
 0x33b   : > { %v1643_v50 = vrot.slane %v1635_v35, %v3684_v2  ;;  %v3832_v52 = vrot.slane %v1636_v4, %v3684_v2  ;;  %v1290_v28 = vcombine.high %v3782_v45, %v3785_v46  ;;  %v992_v29 = vcombine.high %v3801_v56, %v983_v12 }
 0x33c   : > { %v994_v45 = vcombine.high %v974_v13, %v990_v23 }
 0x33d   : > { %v1651_v53 = vcombine.low %v1627_v47, %v1643_v50  ;;  %v1653_v54 = vcombine.low %v3829_v51, %v3832_v52  ;;  %v1654_v57 = vcombine.high %v3829_v51, %v3832_v52  ;;  %3181 = vmatmul.mubr.msk.bf16.vlgmr.msra.gmra.mxu0 %vm1663_vm3, %v1655_v36  ;;  %v1662_v61 = vpack.c.bf16 %v1358_v60, %v1290_v28 }
 0x33e   : > { %3193 = vmatmul.mubr.msk.bf16.vlgmr.msra.gmra.mxu1 %vm1663_vm3, %v1657_v37  ;;  %3185 = vmatpush3.bf16.xpose.msra.mxu0 %v1715_v58  ;;  %v1656_v48 = vpack.c.bf16 %v1060_v31, %v992_v29  ;;  %v1658_v46 = vpack.c.bf16 %v1062_v30, %v994_v45  ;;  %v1652_v56 = vcombine.high %v1627_v47, %v1643_v50 }
 0x33f   : > { %3203 = vmatpush3.msra.mxu1 %v1651_v53  ;;  %3186 = vmatprep.mubr.msk.bf16.mxu0 %vm3438_vm2, %v3437_v17  ;;  %v1809_v55 = vsel %vm1663_vm3, %v1662_v61, 0 }
 0x340   : > { %3196 = vmatprep.subr.bf16.mxu0 %v3437_v17  ;;  %3204 = vmatprep.subr.mxu1 %v3437_v17 }
 0x341   : > { %3206 = vmatprep.mubr.msk.bf16.mxu1 %vm3438_vm2, %v3437_v17 }
 0x345   : > { %3187 = vmatmul.mubr.msk.bf16.vlgmr.msra.gmra.mxu0 %vm1663_vm3, %v1656_v48 }
 0x346   : > { %3197 = vmatpush3.bf16.xpose.msra.mxu0 %v1809_v55  ;;  %3198 = vmatprep.mubr.msk.bf16.mxu0 %vm3438_vm2, %v3437_v17 }
 0x347   : > { %3210 = vmatprep.subr.mxu0 %v3437_v17 }
 0x34d   : > { %3199 = vmatmul.mubr.msk.bf16.vlgmr.msra.gmra.mxu0 %vm1663_vm3, %v1658_v46 }
 0x34e   : > { %3211 = vmatpush3.msra.mxu0 %v1652_v56  ;;  %3214 = vmatprep.mubr.msk.bf16.mxu0 %vm3438_vm2, %v3437_v17 }
 0x34f   : > { %3212 = vmatprep.subr.mxu0 %v3437_v17 }
 0x3fd   : > { %v1704_v24 = vpop.f32.mrf.mxu0 }
 0x3fe   : > { %v1798_v25 = vpop.f32.mrf.mxu1  ;;  %v1853_v31 = vsel %vm1852_vm4, %v1704_v24, -inf }
 0x3ff   : > { %1854 = vmax.xlane.f32.xlu0 %v1853_v31  ;;  %v3182_v62 = vpop.f32.mrf.mxu0  ;;  %v1865_v27 = vsel %vm1852_vm4, %v1798_v25, -inf }
 0x400   : > { %v3194_v63 = vpop.f32.mrf.mxu1 }
 0x401   : > { %v1707_v0 = vpop.f32.mrf.mxu0 }
 0x402   : > { %v1801_v26 = vpop.f32.mrf.mxu1  ;;  %v1856_v30 = vsel %vm1852_vm4, %v1707_v0, -inf }
 0x403   : > { %1866 = vmax.xlane.f32.xlu0 %v1865_v27  ;;  %1857 = vmax.xlane.f32.xlu1 %v1856_v30  ;;  %v3183_v1 = vpop.f32.mrf.mxu0  ;;  %v1868_v5 = vsel %vm1852_vm4, %v1801_v26, -inf }
 0x404   : > { %v3195_v9 = vpop.f32.mrf.mxu1 }
 0x405   : > { %v1751_v10 = vpop.f32.mrf.mxu0 }
 0x406   : > { %v1859_v6 = vsel %vm1852_vm4, %v1751_v10, -inf }
 0x407   : > { %1869 = vmax.xlane.f32.xlu1 %v1868_v5  ;;  %1860 = vmax.xlane.f32.xlu0 %v1859_v6  ;;  %v3188_v21 = vpop.f32.mrf.mxu0 }
 0x409   : > { %v1754_v11 = vpop.f32.mrf.mxu0 }
 0x40a   : > { %v1862_v12 = vsel %vm1852_vm4, %v1754_v11, -inf }
 0x40b   : > { %1863 = vmax.xlane.f32.xlu0 %v1862_v12  ;;  %v3189_v13 = vpop.f32.mrf.mxu0 }
 0x40d   : > { %v1845_v14 = vpop.f32.mrf.mxu0 }
 0x40e   : > { %v1871_v15 = vsel %vm1852_vm4, %v1845_v14, -inf }
 0x40f   : > { %1872 = vmax.xlane.f32.xlu0 %v1871_v15  ;;  %v3200_v16 = vpop.f32.mrf.mxu0 }
 0x411   : > { %v1848_v18 = vpop.f32.mrf.mxu0 }
 0x412   : > { %v1874_v19 = vsel %vm1852_vm4, %v1848_v18, -inf }
 0x413   : > { %1875 = vmax.xlane.f32.xlu1 %v1874_v19  ;;  %v3201_v20 = vpop.f32.mrf.mxu0 }
 0x424   : > { %1363 = vrot.lane.b32.xlu1 %v3664_v44, %s3445_s30 }
 0x425   : > { %1359 = vrot.lane.b32.xlu0 %v3654_v38, %s3445_s30 }
 0x488   : > { %v1855_v23 = vpop.xlane.xlu0 %1854 }
 0x489   : > { %v1877_v32 = vsub.f32 %v1704_v24, %v1855_v23 }
 0x48b   : > { %v1885_v33 = vmul.f32 1.442695, %v1877_v32 }
 0x48c   : > { %v1867_v34 = vpop.xlane.xlu0 %1866  ;;  %v1858_v7 = vpop.xlane.xlu1 %1857 }
 0x48d   : > { %3355 = vpow2.f32 %v1885_v33  ;;  %v1881_v8 = vsub.f32 %v1798_v25, %v1867_v34  ;;  %v1878_v22 = vsub.f32 %v1707_v0, %v1858_v7 }
 0x48f   : > { %v1893_v3 = vmul.f32 1.442695, %v1881_v8  ;;  %v1887_v35 = vmul.f32 1.442695, %v1878_v22 }
 0x490   : > { %v1870_v39 = vpop.xlane.xlu1 %1869  ;;  %v1861_v4 = vpop.xlane.xlu0 %1860 }
 0x491   : > { %3357 = vpow2.f32 %v1893_v3  ;;  %v1882_v40 = vsub.f32 %v1801_v26, %v1870_v39  ;;  %v1879_v41 = vsub.f32 %v1751_v10, %v1861_v4 }
 0x492   : > { %3359 = vpow2.f32 %v1887_v35 }
 0x493   : > { %v1895_v44 = vmul.f32 1.442695, %v1882_v40  ;;  %v1889_v42 = vmul.f32 1.442695, %v1879_v41 }
 0x494   : > { %v1864_v47 = vpop.xlane.xlu0 %1863 }
 0x495   : > { %3361 = vpow2.f32 %v1895_v44  ;;  %v1880_v38 = vsub.f32 %v1754_v11, %v1864_v47 }
 0x496   : > { %3363 = vpow2.f32 %v1889_v42 }
 0x497   : > { %v1891_v50 = vmul.f32 1.442695, %v1880_v38 }
 0x498   : > { %v1873_v36 = vpop.xlane.xlu0 %1872 }
 0x499   : > { %3365 = vpow2.f32 %v1891_v50  ;;  %v1883_v37 = vsub.f32 %v1845_v14, %v1873_v36 }
 0x49a   : > { %v3885_v53 = vpop.eup %3355 }
 0x49b   : > { %v1897_v58 = vmul.f32 1.442695, %v1883_v37  ;;  %v1901_v60 = vsel %vm1852_vm4, %v3885_v53, 0.0 }
 0x49c   : > { %1902 = vadd.xlane.f32.xlu0 %v1901_v60  ;;  %v1876_v28 = vpop.xlane.xlu1 %1875  ;;  %v1360_v1 = vpop.permute.xlu0 %1359 }
 0x49d   : > { %3367 = vpow2.f32 %v1897_v58  ;;  %v1884_v29 = vsub.f32 %v1848_v18, %v1876_v28 }
 0x49e   : > { %v3889_v61 = vpop.eup %3357 }
 0x49f   : > { %v3891_v48 = vpop.eup %3359  ;;  %v1899_v55 = vmul.f32 1.442695, %v1884_v29  ;;  %v1913_v45 = vsel %vm1852_vm4, %v3889_v61, 0.0 }
 0x4a0   : > { %1914 = vadd.xlane.f32.xlu0 %v1913_v45  ;;  %v1904_v46 = vsel %vm1852_vm4, %v3891_v48, 0.0  ;;  %v1364_v10 = vpop.permute.xlu1 %1363 }
 0x4a1   : > { %3369 = vpow2.f32 %v1899_v55  ;;  %1905 = vadd.xlane.f32.xlu1 %v1904_v46 }
 0x4a2   : > { %v3897_v56 = vpop.eup %3361 }
 0x4a3   : > { %v3899_v24 = vpop.eup %3363  ;;  %v1916_v25 = vsel %vm1852_vm4, %v3897_v56, 0.0 }
 0x4a4   : > { %v1907_v31 = vsel %vm1852_vm4, %v3899_v24, 0.0 }
 0x4a5   : > { %1908 = vadd.xlane.f32.xlu0 %v1907_v31  ;;  %1917 = vadd.xlane.f32.xlu1 %v1916_v25 }
 0x4a6   : > { %v3366_v62 = vpop.eup %3365 }
 0x4a7   : > { %v1910_v63 = vsel %vm1852_vm4, %v3366_v62, 0.0 }
 0x4a9   : > { %1911 = vadd.xlane.f32.xlu1 %v1910_v63 }
 0x4aa   : > { %v3906_v0 = vpop.eup %3367 }
 0x4ab   : > { %v1919_v26 = vsel %vm1852_vm4, %v3906_v0, 0.0 }
 0x4ac   : > { %1920 = vadd.xlane.f32.xlu0 %v1919_v26 }
 0x4ae   : > { %v3910_v27 = vpop.eup %3369 }
 0x4af   : > { %v1922_v30 = vsel %vm1852_vm4, %v3910_v27, 0.0 }
 0x4b0   : > { %1923 = vadd.xlane.f32.xlu1 %v1922_v30 }
 0x4c1   : > { %1371 = vrot.lane.b32.xlu1 %v3671_v49, %s3445_s30 }
 0x4c2   : > { %1367 = vrot.lane.b32.xlu0 %v3662_v43, %s3445_s30 }
 0x525   : > { %v1903_v9 = vpop.xlane.xlu0 %1902 }
 0x529   : > { %v1915_v6 = vpop.xlane.xlu0 %1914 }
 0x52a   : > { %v1906_v5 = vpop.xlane.xlu1 %1905 }
 0x52b   : > { %3371 = vrcp.f32 %v1906_v5 }
 0x52e   : > { %v1918_v21 = vpop.xlane.xlu1 %1917  ;;  %v1909_v11 = vpop.xlane.xlu0 %1908 }
 0x532   : > { %v1912_v12 = vpop.xlane.xlu1 %1911 }
 0x533   : > { %3373 = vrcp.f32 %v1912_v12 }
 0x534   : > { %3375 = vrcp.f32 %v1903_v9 }
 0x535   : > { %v1921_v13 = vpop.xlane.xlu0 %1920  ;;  %3377 = vrcp.f32 %v1909_v11 }
 0x536   : > { %3379 = vrcp.f32 %v1915_v6 }
 0x537   : > { %3381 = vrcp.f32 %v1918_v21 }
 0x538   : > { %v3372_v47 = vpop.eup %3371 }
 0x539   : > { %v1368_v14 = vpop.permute.xlu0 %1367  ;;  %v1924_v15 = vpop.xlane.xlu1 %1923  ;;  %v1934_v45 = vmul.f32 %v3372_v47, %v3891_v48 }
 0x53a   : > { %v1383_v16 = vcombine.low %v1360_v1, %v1368_v14  ;;  %v1384_v18 = vcombine.high %v1360_v1, %v1368_v14  ;;  %3383 = vrcp.f32 %v1924_v15 }
 0x53b   : > { %3385 = vrcp.f32 %v1921_v13 }
 0x53c   : > { %v1391_v20 = vrot.slane %v1383_v16, %v3677_v59  ;;  %v1398_v23 = vrot.slane %v1384_v18, %v3677_v59 }
 0x53d   : > { %v1372_v49 = vpop.permute.xlu1 %1371 }
 0x53e   : > { %v1399_v19 = vcombine.low %v1364_v10, %v1372_v49  ;;  %v1400_v43 = vcombine.high %v1364_v10, %v1372_v49 }
 0x540   : > { %v1407_v32 = vrot.slane %v1399_v19, %v3677_v59  ;;  %v1414_v33 = vrot.slane %v1400_v43, %v3677_v59  ;;  %v3374_v38 = vpop.eup %3373 }
 0x541   : > { %v3376_v60 = vpop.eup %3375  ;;  %v1936_v46 = vmul.f32 %v3374_v38, %v3366_v62 }
 0x542   : > { %v1415_v34 = vcombine.low %v1391_v20, %v1407_v32  ;;  %v1416_v7 = vcombine.high %v1391_v20, %v1407_v32  ;;  %v1431_v8 = vcombine.low %v1398_v23, %v1414_v33  ;;  %v1432_v22 = vcombine.high %v1398_v23, %v1414_v33  ;;  %v3378_v28 = vpop.eup %3377 }
 0x543   : > { %v3380_v63 = vpop.eup %3379  ;;  %v1933_v1 = vmul.f32 %v3376_v60, %v3885_v53  ;;  %v1935_v9 = vmul.f32 %v3378_v28, %v3899_v24 }
 0x544   : > { %v1423_v3 = vrot.slane %v1415_v34, %v3684_v2  ;;  %v1430_v35 = vrot.slane %v1416_v7, %v3684_v2  ;;  %v1439_v39 = vrot.slane %v1431_v8, %v3684_v2  ;;  %v1446_v4 = vrot.slane %v1432_v22, %v3684_v2  ;;  %v3382_v10 = vpop.eup %3381 }
 0x545   : > { %v1941_v21 = vpack.c.bf16 %v1934_v45, %v1933_v1  ;;  %v1942_v11 = vpack.c.bf16 %v1936_v46, %v1935_v9  ;;  %v1938_v53 = vmul.f32 %v3382_v10, %v3897_v56  ;;  %v1937_v56 = vmul.f32 %v3380_v63, %v3889_v61 }
 0x546   : > { %v1519_v40 = vcombine.low %v1423_v3, %v1430_v35  ;;  %v3089_v41 = vcombine.high %v1423_v3, %v1430_v35  ;;  %v1535_v44 = vcombine.low %v1439_v39, %v1446_v4  ;;  %v3090_v42 = vcombine.high %v1439_v39, %v1446_v4 }
 0x547   : > { %v3384_v62 = vpop.eup %3383  ;;  %v1943_v51 = vpack.c.bf16 %v1938_v53, %v1937_v56 }
 0x548   : > { %v1526_v50 = vrot.slane %v1519_v40, %v3677_v59  ;;  %v1534_v36 = vrot.slane %v3089_v41, %v3677_v59  ;;  %v1542_v37 = vrot.slane %v1535_v44, %v3677_v59  ;;  %v1550_v58 = vrot.slane %v3090_v42, %v3677_v59  ;;  %v3386_v13 = vpop.eup %3385 }
 0x549   : > { %v1940_v15 = vmul.f32 %v3384_v62, %v3910_v27  ;;  %v1939_v16 = vmul.f32 %v3386_v13, %v3906_v0 }
 0x54a   : > { %v1551_v29 = vcombine.low %v1526_v50, %v1534_v36  ;;  %v1567_v55 = vcombine.low %v1542_v37, %v1550_v58  ;;  %v1552_v25 = vcombine.high %v1526_v50, %v1534_v36  ;;  %v1568_v31 = vcombine.high %v1542_v37, %v1550_v58 }
 0x54b   : > { %v1944_v52 = vpack.c.bf16 %v1940_v15, %v1939_v16 }
 0x54c   : > { %v1559_v26 = vrot.slane %v1551_v29, %v3684_v2  ;;  %v1575_v30 = vrot.slane %v1567_v55, %v3684_v2  ;;  %v1566_v12 = vrot.slane %v1552_v25, %v3684_v2  ;;  %v1582_v48 = vrot.slane %v1568_v31, %v3684_v2 }
 0x54e   : > { %v1583_v5 = vcombine.low %v1559_v26, %v1575_v30  ;;  %v1584_v6 = vcombine.high %v1559_v26, %v1575_v30  ;;  %v1585_v24 = vcombine.low %v1566_v12, %v1582_v48  ;;  %v1586_v14 = vcombine.high %v1566_v12, %v1582_v48 }
 0x550   : > { %3205 = vmatpush3.msra.mxu1 %v1583_v5  ;;  %3213 = vmatpush3.msra.mxu0 %v1584_v6 }
 0x551   : > { %3207 = vmatmul.mubr.msk.bf16.vlgmr.msra.gmra.mxu1 %vm1852_vm4, %v1941_v21  ;;  %3215 = vmatmul.mubr.msk.bf16.vlgmr.msra.gmra.mxu0 %vm1852_vm4, %v1942_v11 }
 0x552   : > { %3218 = vmatprep.subr.mxu1 %v3437_v17  ;;  %3226 = vmatprep.subr.mxu0 %v3437_v17 }
 0x553   : > { %3219 = vmatpush3.msra.mxu1 %v1653_v54  ;;  %3227 = vmatpush3.msra.mxu0 %v1654_v57 }
 0x554   : > { %3220 = vmatprep.subr.mxu1 %v3437_v17  ;;  %3228 = vmatprep.subr.mxu0 %v3437_v17 }
 0x555   : > { %3221 = vmatpush3.msra.mxu1 %v1585_v24  ;;  %3229 = vmatpush3.msra.mxu0 %v1586_v14 }
 0x556   : > { %3222 = vmatprep.mubr.msk.bf16.mxu1 %vm3438_vm2, %v3437_v17  ;;  %3230 = vmatprep.mubr.msk.bf16.mxu0 %vm3438_vm2, %v3437_v17 }
 0x557   : > { %3234 = vmatprep.subr.bf16.mxu1 %v3437_v17  ;;  %3242 = vmatprep.subr.bf16.mxu0 %v3437_v17 }
 0x559   : > { %3223 = vmatmul.mubr.msk.bf16.vlgmr.msra.gmra.mxu1 %vm1852_vm4, %v1943_v51  ;;  %3231 = vmatmul.mubr.msk.bf16.vlgmr.msra.gmra.mxu0 %vm1852_vm4, %v1944_v52 }
 0x55a   : > { %3238 = vmatprep.mubr.msk.bf16.mxu1 %vm3438_vm2, %v3437_v17  ;;  %3246 = vmatprep.mubr.msk.bf16.mxu0 %vm3438_vm2, %v3437_v17 }
 0x611   : > { %v2014_v54 = vpop.f32.mrf.mxu1  ;;  %v2090_v57 = vpop.f32.mrf.mxu0 }
 0x613   : > { %v3208_v61 = vpop.f32.mrf.mxu1  ;;  %v3216_v0 = vpop.f32.mrf.mxu0 }
 0x614   : > { %v3339_v0 = vld [vmem:[%s3579_s0 + $0x8] sm:$0xff]  }
 0x615   : > { %v2017_v27 = vpop.f32.mrf.mxu1  ;;  %v2093_v18 = vpop.f32.mrf.mxu0  ;;  %3235 = vmatpush3.bf16.msra.mxu1 %v3339_v0 }
 0x616   : > { %3236 = vmatprep.subr.bf16.mxu1 %v3437_v17 }
 0x617   : > { %v3209_v49 = vpop.f32.mrf.mxu1  ;;  %v3217_v19 = vpop.f32.mrf.mxu0 }
 0x619   : > { %v2166_v43 = vpop.f32.mrf.mxu1  ;;  %v2242_v20 = vpop.f32.mrf.mxu0 }
 0x61a   : > { %v2249_v23 = vcombine.low %v2014_v54, %v2166_v43  ;;  %v2250_v32 = vcombine.high %v2014_v54, %v2166_v43  ;;  %v2265_v33 = vcombine.low %v2090_v57, %v2242_v20  ;;  %v2266_v34 = vcombine.high %v2090_v57, %v2242_v20 }
 0x61b   : > { %v3224_v7 = vpop.f32.mrf.mxu1  ;;  %v3232_v8 = vpop.f32.mrf.mxu0 }
 0x61c   : > { %v2257_v22 = vrot.slane %v2249_v23, %v3677_v59  ;;  %v2264_v3 = vrot.slane %v2250_v32, %v3677_v59  ;;  %v2273_v35 = vrot.slane %v2265_v33, %v3677_v59  ;;  %v2280_v39 = vrot.slane %v2266_v34, %v3677_v59 }
 0x61d   : > { %v2169_v4 = vpop.f32.mrf.mxu1  ;;  %v2245_v40 = vpop.f32.mrf.mxu0 }
 0x61e   : > { %v2281_v41 = vcombine.low %v2257_v22, %v2273_v35  ;;  %v2282_v44 = vcombine.high %v2257_v22, %v2273_v35  ;;  %v2297_v42 = vcombine.low %v2264_v3, %v2280_v39  ;;  %v2298_v47 = vcombine.high %v2264_v3, %v2280_v39  ;;  %v3340_v3 = vld [vmem:[%s3579_s0] sm:$0xff]   ;;  %s3446_s0 = smov 16  }
 0x61f   : > { %v2317_v38 = vcombine.low %v2017_v27, %v2169_v4  ;;  %v2318_v50 = vcombine.high %v2017_v27, %v2169_v4  ;;  %v2333_v36 = vcombine.low %v2093_v18, %v2245_v40  ;;  %v2334_v37 = vcombine.high %v2093_v18, %v2245_v40  ;;  %v3225_v58 = vpop.f32.mrf.mxu1  ;;  %v3233_v60 = vpop.f32.mrf.mxu0  ;;  %3237 = vmatpush3.bf16.msra.mxu1 %v3340_v3 }
 0x620   : > { %v2289_v28 = vrot.slane %v2281_v41, %v3684_v2  ;;  %v2296_v29 = vrot.slane %v2282_v44, %v3684_v2  ;;  %v2305_v55 = vrot.slane %v2297_v42, %v3684_v2  ;;  %v2312_v45 = vrot.slane %v2298_v47, %v3684_v2  ;;  %3250 = vmatprep.subr.bf16.mxu1 %v3437_v17 }
 0x621   : > { %v2325_v46 = vrot.slane %v2317_v38, %v3677_v59  ;;  %v2332_v25 = vrot.slane %v2318_v50, %v3677_v59  ;;  %v2341_v31 = vrot.slane %v2333_v36, %v3677_v59  ;;  %v2348_v63 = vrot.slane %v2334_v37, %v3677_v59 }
 0x622   : > { %v2385_v26 = vcombine.low %v2289_v28, %v2296_v29  ;;  %v3101_v30 = vcombine.high %v2289_v28, %v2296_v29  ;;  %v2401_v1 = vcombine.low %v2305_v55, %v2312_v45  ;;  %v3102_v9 = vcombine.high %v2305_v55, %v2312_v45 }
 0x623   : > { %v2349_v10 = vcombine.low %v2325_v46, %v2341_v31  ;;  %v2350_v5 = vcombine.high %v2325_v46, %v2341_v31  ;;  %v2365_v6 = vcombine.low %v2332_v25, %v2348_v63  ;;  %v2366_v21 = vcombine.high %v2332_v25, %v2348_v63 }
 0x624   : > { %v2392_v11 = vrot.slane %v2385_v26, %v3677_v59  ;;  %v2400_v12 = vrot.slane %v3101_v30, %v3677_v59  ;;  %v2408_v48 = vrot.slane %v2401_v1, %v3677_v59  ;;  %v2416_v62 = vrot.slane %v3102_v9, %v3677_v59 }
 0x625   : > { %v2357_v13 = vrot.slane %v2349_v10, %v3684_v2  ;;  %v2364_v53 = vrot.slane %v2350_v5, %v3684_v2  ;;  %v2373_v24 = vrot.slane %v2365_v6, %v3684_v2  ;;  %v2380_v14 = vrot.slane %v2366_v21, %v3684_v2  ;;  %v3108_v21 = vld [vmem:[%s4126_s19] ss:$0 sm:$0xff] }
 0x626   : > { %v2418_v15 = vcombine.high %v2392_v11, %v2400_v12  ;;  %v2434_v56 = vcombine.high %v2408_v48, %v2416_v62  ;;  %v2417_v16 = vcombine.low %v2392_v11, %v2400_v12  ;;  %v2433_v51 = vcombine.low %v2408_v48, %v2416_v62  ;;  %v3395_v11 = vld [vmem:[%s3615_s2] sm:$0xff] }
 0x627   : > { %v2453_v52 = vcombine.low %v2357_v13, %v2364_v53  ;;  %v3103_v54 = vcombine.high %v2357_v13, %v2364_v53  ;;  %v2469_v57 = vcombine.low %v2373_v24, %v2380_v14  ;;  %v3104_v61 = vcombine.high %v2373_v24, %v2380_v14  ;;  %v3396_v53 = vld [vmem:[%s3615_s2 + $0x8] sm:$0xff] }
 0x628   : > { %v2425_v27 = vrot.slane %v2417_v16, %v3684_v2  ;;  %v2441_v18 = vrot.slane %v2433_v51, %v3684_v2  ;;  %v2432_v23 = vrot.slane %v2418_v15, %v3684_v2  ;;  %v2448_v32 = vrot.slane %v2434_v56, %v3684_v2 }
 0x629   : > { %v2460_v49 = vrot.slane %v2453_v52, %v3677_v59  ;;  %v2468_v19 = vrot.slane %v3103_v54, %v3677_v59  ;;  %v2476_v43 = vrot.slane %v2469_v57, %v3677_v59  ;;  %v2484_v20 = vrot.slane %v3104_v61, %v3677_v59 }
 0x62a   : > { %v2449_v33 = vcombine.low %v2425_v27, %v2441_v18  ;;  %v2451_v40 = vcombine.low %v2432_v23, %v2448_v32  ;;  %v2450_v44 = vcombine.high %v2425_v27, %v2441_v18  ;;  %v2452_v37 = vcombine.high %v2432_v23, %v2448_v32 }
 0x62b   : > { %v2486_v34 = vcombine.high %v2460_v49, %v2468_v19  ;;  %v2502_v7 = vcombine.high %v2476_v43, %v2484_v20  ;;  %v2485_v8 = vcombine.low %v2460_v49, %v2468_v19  ;;  %v2501_v22 = vcombine.low %v2476_v43, %v2484_v20  ;;  %v3341_v43 = vld [vmem:[%s3596_s26 + $0x8] sm:$0xff]   ;;  %v3342_v20 = vld [vmem:[%s3596_s26] sm:$0xff]   ;;  %s4127_s26 = scalar_lea.vmem %s4094_s7, %s3553_s15 }
 0x62c   : > { %3243 = vmatpush3.bf16.msra.mxu0 %v3341_v43 }
 0x62d   : > { %v2500_v35 = vrot.slane %v2486_v34, %v3684_v2  ;;  %v2516_v39 = vrot.slane %v2502_v7, %v3684_v2  ;;  %v2493_v4 = vrot.slane %v2485_v8, %v3684_v2  ;;  %v2509_v59 = vrot.slane %v2501_v22, %v3684_v2  ;;  %3244 = vmatprep.subr.bf16.mxu0 %v3437_v17 }
 0x62f   : > { %v2519_v41 = vcombine.low %v2500_v35, %v2516_v39  ;;  %v2518_v42 = vcombine.high %v2493_v4, %v2509_v59  ;;  %v2517_v47 = vcombine.low %v2493_v4, %v2509_v59  ;;  %v2520_v36 = vcombine.high %v2500_v35, %v2516_v39  ;;  %v3109_v35 = vld [vmem:[%s4127_s26] ss:$0 sm:$0xff] }
 0x630   : > { %3245 = vmatpush3.bf16.msra.mxu0 %v3342_v20 }
 0x631   : > { %v3327_v38 = vpack.i.bf16 %v2519_v41, %v2451_v40  ;;  %v3322_v50 = vpack.i.bf16 %v2518_v42, %v2450_v44  ;;  %v3332_v58 = vpack.i.bf16 %v2520_v36, %v2452_v37  ;;  %v3110_v40 = vld [vmem:[%s4128_s21] ss:$0 sm:$0xff]  ;;  %v3345_v36 = vld [vmem:[%s3610_s22 + $0x28] sm:$0xff]  }
 0x632   : > { %v3346_v37 = vld [vmem:[%s3610_s22 + $0x20] sm:$0xff]  }
 0x633   : > { %3328 = vrot.lane.b32.xlu1 %v3327_v38, %s3446_s0  ;;  %3323 = vrot.lane.b32.xlu0 %v3322_v50, %s3447_s3  ;;  %v3343_v38 = vld [vmem:[%s3610_s22 + $0x38] sm:$0xff]   ;;  %v3344_v50 = vld [vmem:[%s3610_s22 + $0x30] sm:$0xff]  }
 0x637   : > { %3333 = vrot.lane.b32.xlu0 %v3332_v58, %s3448_s5  ;;  %v3347_v58 = vld [vmem:[%s3610_s22 + $0x18] sm:$0xff]  }
 0x6a5   : > { %v3329_v2 = vpop.permute.xlu1 %3328  ;;  %v3324_v60 = vpop.permute.xlu0 %3323 }
 0x6a6   : > { %v3326_v28 = vunpack.i.h.bf16 %v3324_v60  ;;  %v3325_v29 = vunpack.i.l.bf16 %v3324_v60  ;;  %v3331_v55 = vunpack.i.h.bf16 %v3329_v2  ;;  %v3330_v45 = vunpack.i.l.bf16 %v3329_v2  ;;  %v3348_v2 = vld [vmem:[%s3610_s22 + $0x10] sm:$0xff]   ;;  %v3349_v60 = vld [vmem:[%s3610_s22 + $0x8] sm:$0xff]  }
 0x6a8   : > { %v2545_v46 = vsel %vm1663_vm3, %v2449_v33, %v3325_v29  ;;  %v2546_v25 = vsel %vm1663_vm3, %v2517_v47, %v3326_v28  ;;  %v3350_v28 = vld [vmem:[%s3610_s22] sm:$0xff]  }
 0x6a9   : > { %v3334_v31 = vpop.permute.xlu0 %3333  ;;  %v2547_v30 = vsel %vm1852_vm4, %v2545_v46, %v3330_v45  ;;  %v2548_v1 = vsel %vm1852_vm4, %v2546_v25, %v3331_v55  ;;  %v3111_v29 = vld [vmem:[%s631_s13] ss:$0 sm:$0xff] }
 0x6aa   : > { %v3336_v63 = vunpack.i.h.bf16 %v3334_v31  ;;  %v3335_v26 = vunpack.i.l.bf16 %v3334_v31 }
 0x6ac   : > { %v2550_v9 = vsel %vm2549_vm5, %v2547_v30, %v3335_v26  ;;  %v2551_v10 = vsel %vm2549_vm5, %v2548_v1, %v3336_v63 }
 0x6ad   : > { %v2556_v5 = vpack.c.bf16 %v2551_v10, %v2550_v9 }
 0x6af   : > { %3239 = vmatmul.mubr.msk.bf16.vlgmr.msra.gmra.mxu1 %vm659_vm1, %v2556_v5 }
 0x6b0   : > { %3266 = vmatprep.mubr.msk.bf16.mxu1 %vm3438_vm2, %v3437_v17  ;;  %3251 = vmatpush3.bf16.msra.mxu1 %v3343_v38 }
 0x6b1   : > { %3252 = vmatprep.subr.bf16.mxu1 %v3437_v17 }
 0x6b4   : > { %3253 = vmatpush3.bf16.msra.mxu1 %v3344_v50 }
 0x6b5   : > { %3254 = vmatprep.subr.bf16.mxu1 %v3437_v17 }
 0x6b8   : > { %3255 = vmatpush3.bf16.msra.mxu1 %v3345_v36 }
 0x6b9   : > { %3256 = vmatprep.subr.bf16.mxu1 %v3437_v17 }
 0x6bc   : > { %3257 = vmatpush3.bf16.msra.mxu1 %v3346_v37 }
 0x6bd   : > { %3258 = vmatprep.subr.bf16.mxu1 %v3437_v17 }
 0x6c0   : > { %3259 = vmatpush3.bf16.msra.mxu1 %v3347_v58 }
 0x6c1   : > { %3260 = vmatprep.subr.bf16.mxu1 %v3437_v17 }
 0x6c4   : > { %3261 = vmatpush3.bf16.msra.mxu1 %v3348_v2 }
 0x6c5   : > { %3262 = vmatprep.subr.bf16.mxu1 %v3437_v17 }
 0x6c8   : > { %3263 = vmatpush3.bf16.msra.mxu1 %v3349_v60 }
 0x6c9   : > { %3264 = vmatprep.subr.bf16.mxu1 %v3437_v17 }
 0x6cc   : > { %3265 = vmatpush3.bf16.msra.mxu1 %v3350_v28 }
 0x76f   : > { %v2606_v6 = vpop.f32.mrf.mxu1 }
 0x770   : > { %v2613_v12 = vadd.f32 %v3395_v11, %v2606_v6 }
 0x771   : > { %v3240_v48 = vpop.f32.mrf.mxu1 }
 0x772   : > { %v4014_v62 = vadd.f32 %v3108_v21, %v2613_v12 }
 0x773   : > { %v2609_v13 = vpop.f32.mrf.mxu1 }
 0x774   : > { %v2614_v24 = vadd.f32 %v3396_v53, %v2609_v13  ;;  %v2626_v14 = vsel %vm659_vm1, %v4014_v62, 0.0 }
 0x775   : > { %2627 = vadd.xlane.f32.xlu1 %v2626_v14  ;;  %v3241_v15 = vpop.f32.mrf.mxu1 }
 0x776   : > { %v4019_v56 = vadd.f32 %v3108_v21, %v2614_v24 }
 0x778   : > { %v2629_v16 = vsel %vm659_vm1, %v4019_v56, 0.0 }
 0x779   : > { %2630 = vadd.xlane.f32.xlu0 %v2629_v16 }
 0x7fe   : > { %v2628_v51 = vpop.xlane.xlu1 %2627 }
 0x7ff   : > { %v2632_v52 = vmul.f32 0.03125, %v2628_v51 }
 0x801   : > { %v2634_v54 = vsub.f32 %v4014_v62, %v2632_v52  ;;  %v3115_v52 = vld [vmem:[%s639_s23] ss:$0 sm:$0xff] }
 0x802   : > { %v2631_v57 = vpop.xlane.xlu0 %2630 }
 0x803   : > { %v2633_v61 = vmul.f32 0.03125, %v2631_v57  ;;  %v2636_v0 = vmul.f32 %v2634_v54, %v2634_v54 }
 0x805   : > { %v2635_v27 = vsub.f32 %v4019_v56, %v2633_v61  ;;  %v2638_v18 = vsel %vm659_vm1, %v2636_v0, 0.0 }
 0x806   : > { %2639 = vadd.xlane.f32.xlu0 %v2638_v18 }
 0x807   : > { %v2637_v49 = vmul.f32 %v2635_v27, %v2635_v27 }
 0x809   : > { %v2641_v19 = vsel %vm659_vm1, %v2637_v49, 0.0 }
 0x80a   : > { %2642 = vadd.xlane.f32.xlu0 %v2641_v19 }
 0x88f   : > { %v2640_v23 = vpop.xlane.xlu0 %2639 }
 0x890   : > { %v2644_v32 = vmul.f32 0.03125, %v2640_v23 }
 0x892   : > { %v2646_v33 = vadd.f32 1e-05, %v2644_v32 }
 0x893   : > { %v2643_v34 = vpop.xlane.xlu0 %2642 }
 0x894   : > { %3387 = vrsqrt.f32 %v2646_v33  ;;  %v2645_v7 = vmul.f32 0.03125, %v2643_v34 }
 0x896   : > { %v2647_v8 = vadd.f32 1e-05, %v2645_v7 }
 0x898   : > { %3389 = vrsqrt.f32 %v2647_v8 }
 0x8a1   : > { %v3388_v22 = vpop.eup %3387 }
 0x8a2   : > { %v2650_v3 = vmul.f32 %v3388_v22, %v2634_v54 }
 0x8a4   : > { %v2658_v59 = vmul.f32 %v3109_v35, %v2650_v3 }
 0x8a5   : > { %v3390_v39 = vpop.eup %3389 }
 0x8a6   : > { %v2651_v4 = vmul.f32 %v3390_v39, %v2635_v27  ;;  %v2666_v44 = vadd.f32 %v3110_v40, %v2658_v59 }
 0x8a8   : > { %v2659_v41 = vmul.f32 %v3109_v35, %v2651_v4 }
 0x8aa   : > { %v2667_v42 = vadd.f32 %v3110_v40, %v2659_v41 }
 0x8ac   : > { %v2672_v47 = vpack.c.bf16 %v2667_v42, %v2666_v44 }
 0x8ae   : > { %3247 = vmatmul.mubr.msk.bf16.vlgmr.msra.gmra.mxu0 %vm659_vm1, %v2672_v47 }
 0x96e   : > { %v2729_v55 = vpop.f32.mrf.mxu0 }
 0x96f   : > { %v2730_v45 = vadd.f32 %v3111_v29, %v2729_v55 }
 0x970   : > { %v3248_v46 = vpop.f32.mrf.mxu0 }
 0x971   : > { %v2738_v25 = vmul.f32 0.044715, %v2730_v45  ;;  %v2736_v53 = vmul.f32 0.5, %v2730_v45 }
 0x972   : > { %v2732_v31 = vpop.f32.mrf.mxu0 }
 0x973   : > { %v2740_v63 = vmul.f32 %v2738_v25, %v2730_v45  ;;  %v2733_v26 = vadd.f32 %v3111_v29, %v2732_v31 }
 0x974   : > { %v3249_v30 = vpop.f32.mrf.mxu0 }
 0x975   : > { %v2742_v1 = vmul.f32 %v2740_v63, %v2730_v45  ;;  %v2739_v9 = vmul.f32 0.044715, %v2733_v26  ;;  %v2737_v24 = vmul.f32 0.5, %v2733_v26 }
 0x977   : > { %v2744_v10 = vadd.f32 %v2742_v1, %v2730_v45  ;;  %v2741_v5 = vmul.f32 %v2739_v9, %v2733_v26 }
 0x979   : > { %v2746_v6 = vmul.f32 0.7978846, %v2744_v10  ;;  %v2743_v17 = vmul.f32 %v2741_v5, %v2733_v26 }
 0x97b   : > { %3391 = vtanh.f32 %v2746_v6  ;;  %v2745_v21 = vadd.f32 %v2743_v17, %v2733_v26 }
 0x97d   : > { %v2747_v11 = vmul.f32 0.7978846, %v2745_v21 }
 0x97f   : > { %3393 = vtanh.f32 %v2747_v11 }
 0x988   : > { %v3392_v12 = vpop.eup %3391 }
 0x989   : > { %v2750_v48 = vadd.f32 1.0, %v3392_v12 }
 0x98b   : > { %v2752_v15 = vmul.f32 %v2750_v48, %v2736_v53 }
 0x98c   : > { %v3394_v13 = vpop.eup %3393 }
 0x98d   : > { %v2751_v14 = vadd.f32 1.0, %v3394_v13 }
 0x98f   : > { %v2753_v16 = vmul.f32 %v2751_v14, %v2737_v24 }
 0x991   : > { %v2770_v51 = vpack.c.bf16 %v2753_v16, %v2752_v15 }
 0x993   : > { %3267 = vmatmul.mubr.bf16.vlgmr.msra.gmra.mxu1 %v2770_v51 }
 0xa53   : > { %v2860_v54 = vpop.f32.mrf.mxu1 }
 0xa54   : > { %v2861_v57 = vadd.f32 %v3115_v52, %v2860_v54 }
 0xa55   : > { %v3268_v61 = vpop.f32.mrf.mxu1 }
 0xa56   : > { %v2867_v0 = vadd.f32 %v2861_v57, %v4014_v62 }
 0xa57   : > { %v2863_v27 = vpop.f32.mrf.mxu1 }
 0xa58   : > { %2869 = vst.msk [vmem:[%s3615_s2] sm:$0xff] %vm659_vm1, %v2867_v0  ;;  %v2864_v18 = vadd.f32 %v3115_v52, %v2863_v27 }
 0xa59   : > { %v3269_v49 = vpop.f32.mrf.mxu1 }
 0xa5a   : > { %v2868_v19 = vadd.f32 %v2864_v18, %v4019_v56 }
 0xa5c   : > { %2870 = vst.msk [vmem:[%s3615_s2 + $0x8] sm:$0xff] %vm659_vm1, %v2868_v19 }
 0xa5d PF: > { %s4129_s27 = sld [smem:[#allocation5_spill]] }
 0xa5e   : > { %s4130_s25 = sld [smem:[#allocation3_spill]] }
 0xa5f   : > { %s4131_s26 = sld [smem:[#allocation4_spill]] }
 0xa60   : > { %s4133_s28 = sld [smem:[#allocation7_spill]] }
 0xa63   : > { %s23_s29 = sadd.s32 1, %s4129_s27   ;;  %s4132_s27 = sld [smem:[#allocation6_spill]] }
 0xa64   : > { %p20_p8 = scmp.ge.s32.totalorder %s23_s29, 6  }
 0xa66   :  { %22 = sbr.rel (!%p20_p8) target bundleno = 6 (0x6), region = 142 }

</bundles_post_ra>
